<compile_context>
chip_gen: v7x
topology: tpu7x:2x2x1
jax: 0.10.0
libtpu: 0.0.40
codegen_flags: <defaults>
</compile_context>

<pallas_src>
import functools

import jax
import jax.numpy as jnp
from jax.experimental import pallas as pl
from jax.experimental.pallas import tpu as pltpu


def oim_loss_kernel(labels_ref, feat_ref, lut_ref, queue_ref, nll_ref,
                    m_sc, l_sc, t_sc, *,
                    c_tile, n_lut_tiles, n_tiles, num_pid, queue_size):
    """Per-row NLL via online LSE over a C-tiled reduction grid axis.

    labels_ref : [Nb, 1]      i32   pid labels (-1 == ignore_index)
    feat_ref   : [Nb, D]      bf16  reid features for this row block
    lut_ref    : [D, C_TILE]  bf16  current lut tile (transposed, x scalar)
    queue_ref  : [D, C_TILE]  bf16  current queue tile (transposed, x scalar)
    nll_ref    : [Nb, 1]      f32   per-row negative log-likelihood (output)
    m_sc/l_sc/t_sc : [Nb, 1]  f32   running max / sum-exp / target-logit
    """
    c = pl.program_id(1)                       # reduction (class-tile) axis

    @pl.when(c == 0)
    def _init():
        m_sc[...] = jnp.full(m_sc.shape, -jnp.inf, jnp.float32)
        l_sc[...] = jnp.zeros(l_sc.shape, jnp.float32)
        t_sc[...] = jnp.zeros(t_sc.shape, jnp.float32)

    def lse_update(logits):
        m_prev = m_sc[...]
        m_new = jnp.maximum(m_prev, jnp.max(logits, axis=-1, keepdims=True))
        l_sc[...] = (jnp.exp(m_prev - m_new) * l_sc[...]
                     + jnp.sum(jnp.exp(logits - m_new), axis=-1, keepdims=True))
        m_sc[...] = m_new

    # Static tail sizes of the last lut / queue tile (the only tiles that can
    # contain zero-padded weight columns).
    lut_tail = num_pid - (n_lut_tiles - 1) * c_tile
    queue_tail = queue_size - (n_tiles - n_lut_tiles - 1) * c_tile

    # ---------------- LUT phase: target-logit scan + LSE ----------------
    def lut_step(mask_tail):
        logits = jnp.dot(feat_ref[...], lut_ref[...],
                         preferred_element_type=jnp.float32)       # [Nb, Ct] f32
        col = jax.lax.broadcasted_iota(jnp.int32, logits.shape, 1)
        if mask_tail:
            # Boundary tile only: padded lut columns must not enter the LSE.
            logits = jnp.where(col < lut_tail, logits, -1e30)
        hit = (c * c_tile + col) == labels_ref[...]                # [Nb, Ct]
        t_sc[...] += jnp.sum(jnp.where(hit, logits, 0.0), axis=-1, keepdims=True)
        lse_update(logits)

    if lut_tail == c_tile:
        @pl.when(c < n_lut_tiles)
        def _lut_all():
            lut_step(mask_tail=False)
    else:
        @pl.when(c < n_lut_tiles - 1)
        def _lut_interior():
            lut_step(mask_tail=False)

        @pl.when(c == n_lut_tiles - 1)
        def _lut_boundary():
            lut_step(mask_tail=True)

    # ---------------- Queue phase: LSE only (loss_weight == 0) ----------------
    def queue_step(mask_tail, finalize):
        logits = jnp.dot(feat_ref[...], queue_ref[...],
                         preferred_element_type=jnp.float32)       # [Nb, Ct] f32
        if mask_tail:
            col = jax.lax.broadcasted_iota(jnp.int32, logits.shape, 1)
            logits = jnp.where(col < queue_tail, logits, -1e30)
        lse_update(logits)
        if finalize:
            # per-row NLL; weighted mean (and the loss weights) happen in XLA.
            nll_ref[...] = (m_sc[...] + jnp.log(l_sc[...])) - t_sc[...]

    @pl.when(jnp.logical_and(c >= n_lut_tiles, c < n_tiles - 1))
    def _queue_interior():
        queue_step(mask_tail=False, finalize=False)

    @pl.when(c == n_tiles - 1)
    def _queue_boundary():
        queue_step(mask_tail=(queue_tail != c_tile), finalize=True)


def prepare_oim_buffers(lut, queue, *, scalar=10.0, c_tile=512):
    """One-time layout transform: [rows, D] -> scalar * [D, rows_padded] bf16.

    The cross-entropy temperature `scalar` is folded into the persistent
    buffers here (so the kernel never multiplies per step, and there is one
    fewer bf16 rounding). Keep the returned buffers persistently (like the
    module's registered buffers) -- do NOT redo this per training step.
    """
    def prep(w):
        rows, _ = w.shape
        pad = (-rows) % c_tile
        wt = jnp.swapaxes(w, 0, 1) * scalar            # [D, rows]
        if pad:
            wt = jnp.pad(wt, ((0, 0), (0, pad)))       # zero-pad classes
        return wt.astype(jnp.bfloat16)
    return prep(lut), prep(queue)


def oim_loss(features, pids, lut_t, queue_t, num_pid, queue_size, *,
             loss_scale=1.0, c_tile=512, row_tile=128):
    """JAX/Pallas equivalent of OIMLossComputation.forward (after per-image glue).

    lut_t / queue_t: transposed, scaled, C-padded bf16 buffers from
    prepare_oim_buffers (same c_tile!).
    c_tile : class-reduction tile, multiple of 128 (512-2048 for production C).
    row_tile: row block; >=16 (bf16 packing), 128-256 for production batches.
    """
    d, p_pad = lut_t.shape
    d2, q_pad = queue_t.shape
    assert d == d2 and p_pad % c_tile == 0 and q_pad % c_tile == 0
    assert queue_size >= 1 and num_pid >= 1
    n_lut_tiles = p_pad // c_tile
    n_queue_tiles = q_pad // c_tile
    n_tiles = n_lut_tiles + n_queue_tiles

    # aux_label_np[invalid_inds] = -1
    labels = jnp.where(pids < 0, jnp.int32(-1), pids.astype(jnp.int32)).reshape(-1, 1)
    feat = features.astype(jnp.bfloat16)

    # Pad N up to a multiple of the row tile; padded rows get label -1 and
    # zero features (zero loss weight -> no contribution).
    n = feat.shape[0]
    nb = row_tile
    n_pad = max(nb, ((n + nb - 1) // nb) * nb)
    if n_pad != n:
        feat = jnp.pad(feat, ((0, n_pad - n), (0, 0)))
        labels = jnp.pad(labels, ((0, n_pad - n), (0, 0)), constant_values=-1)
    n_row_blocks = n_pad // nb

    kernel = functools.partial(
        oim_loss_kernel, c_tile=c_tile, n_lut_tiles=n_lut_tiles,
        n_tiles=n_tiles, num_pid=int(num_pid), queue_size=int(queue_size))

    cost = pl.CostEstimate(
        flops=2 * n_pad * (p_pad + q_pad) * d,
        transcendentals=n_pad * (p_pad + q_pad),
        bytes_accessed=(n_row_blocks * (p_pad + q_pad) * d * 2
                        + n_pad * d * 2 + n_pad * 4 + n_pad * 4))

    nll = pl.pallas_call(
        kernel,
        out_shape=jax.ShapeDtypeStruct((n_pad, 1), jnp.float32),
        grid_spec=pltpu.PrefetchScalarGridSpec(
            num_scalar_prefetch=0,
            grid=(n_row_blocks, n_tiles),          # rows parallel, classes reduce
            in_specs=[
                pl.BlockSpec((nb, 1), lambda r, c: (r, 0)),
                pl.BlockSpec((nb, d), lambda r, c: (r, 0)),
                # Park on the last lut block during the queue phase and on the
                # first queue block during the lut phase: each HBM buffer is
                # fetched exactly once per row block.
                pl.BlockSpec((d, c_tile),
                             lambda r, c: (0, jnp.minimum(c, n_lut_tiles - 1))),
                pl.BlockSpec((d, c_tile),
                             lambda r, c: (0, jnp.maximum(c - n_lut_tiles, 0))),
            ],
            out_specs=pl.BlockSpec((nb, 1), lambda r, c: (r, 0)),
            scratch_shapes=[pltpu.VMEM((nb, 1), jnp.float32)] * 3),
        compiler_params=pltpu.CompilerParams(
            dimension_semantics=("parallel", "arbitrary")),
        cost_estimate=cost,
    )(labels, feat, lut_t, queue_t)

    # loss_weight == 1 for lut ids, 0 for queue ids / ignore_index (-1).
    # NB: if no valid labels this is 0/0 == NaN, matching PyTorch's
    # weighted-mean cross_entropy behavior.
    pids_i = pids.astype(jnp.int32)
    w = jnp.logical_and(pids_i >= 0, pids_i < num_pid).astype(jnp.float32)
    nll_rows = nll[:n, 0]
    loss = jnp.sum(w * nll_rows) / jnp.sum(w)
    return loss * loss_scale


def _reference_loss(features, pids, lut, queue, num_pid,
                    scalar=10.0, loss_scale=1.0):
    """Pure-JAX f32 reference mirroring F.cross_entropy(weight=..., ignore_index=-1)."""
    W = jnp.concatenate([lut, queue], axis=0)
    logits = (features @ W.T) * scalar
    logp = jax.nn.log_softmax(logits, axis=-1)
    labels = jnp.where(pids < 0, -1, pids)
    valid = (labels >= 0) & (labels < num_pid)
    safe = jnp.clip(labels, 0)
    nll = -jnp.take_along_axis(logp, safe[:, None], axis=1)[:, 0]
    w = jnp.where(valid, 1.0, 0.0)
    return (jnp.sum(w * nll) / jnp.sum(w)) * loss_scale


if __name__ == "__main__":
    key = jax.random.PRNGKey(0)
    k1, k2, k3, k4 = jax.random.split(key, 4)

    # Small, module-consistent shapes: D = REID.OUT_CHANNELS,
    # C = num_pid + queue_size (non-multiples of the tile to exercise masking).
    D = 128
    num_pid, queue_size = 250, 300
    C_TILE = 512          # 1 lut tile (tail 250) + 1 queue tile (tail 300)
    ROW_TILE = 16         # bf16 sublane packing; use 128-256 for real batches

    # Two images: per-image reid features + pids from `results`, gt counts from `targets`.
    feats_img = [jax.random.normal(k1, (5, D), jnp.float32),
                 jax.random.normal(k2, (3, D), jnp.float32)]
    pids_img = [jnp.array([3, 17, -2, 9, -5], jnp.int32),
                jnp.array([42, -1, 7], jnp.int32)]
    gt_counts = [2, 1]

    # Glue identical to the module: gt boxes first (across images), then detections.
    gt_feats = [f[:n] for n, f in zip(gt_counts, feats_img)]
    de_feats = [f[n:] for n, f in zip(gt_counts, feats_img)]
    gt_pids = [p[:n] for n, p in zip(gt_counts, pids_img)]
    de_pids = [p[n:] for n, p in zip(gt_counts, pids_img)]
    features = jnp.concatenate(gt_feats + de_feats, axis=0)   # [N=8, D]
    pids = jnp.concatenate(gt_pids + de_pids, axis=0)         # [N=8]

    # Synthetic deterministic lut/queue buffers (module registers zero buffers;
    # random L2-normalized rows exercise the matmul meaningfully).
    lut = jax.random.normal(k3, (num_pid, D), jnp.float32)
    lut = lut / jnp.linalg.norm(lut, axis=-1, keepdims=True)
    queue = jax.random.normal(k4, (queue_size, D), jnp.float32)
    queue = queue / jnp.linalg.norm(queue, axis=-1, keepdims=True)

    # One-time layout transform + scalar fold (kept persistently in training).
    lut_t, queue_t = prepare_oim_buffers(lut, queue, scalar=10.0, c_tile=C_TILE)

    loss = oim_loss(features, pids, lut_t, queue_t, num_pid, queue_size,
                    loss_scale=1.0, c_tile=C_TILE, row_tile=ROW_TILE)
    jax.block_until_ready(loss)

    ref = _reference_loss(features, pids, lut, queue, num_pid,
                          scalar=10.0, loss_scale=1.0)
    # bf16 matmul operands => loosened tolerance vs the f32 reference.
    assert jnp.allclose(loss, ref, rtol=5e-2, atol=5e-2), (loss, ref)

    print("KERNEL_OK")
</pallas_src>

<mosaic_0001>
module attributes {stable_mosaic.version = 11 : i64} {
  func.func @oim_loss_kernel(%arg0: i32, %arg1: i32, %arg2: memref<16x1xi32, #tpu.memory_space<vmem>>, %arg3: memref<16x128xbf16, #tpu.memory_space<vmem>>, %arg4: memref<128x512xbf16, #tpu.memory_space<vmem>>, %arg5: memref<128x512xbf16, #tpu.memory_space<vmem>>, %arg6: memref<16x1xf32, #tpu.memory_space<vmem>>, %arg7: memref<16x1xf32, #tpu.memory_space<vmem>>, %arg8: memref<16x1xf32, #tpu.memory_space<vmem>>, %arg9: memref<16x1xf32, #tpu.memory_space<vmem>>) attributes {dimension_semantics = [#tpu.dimension_semantics<parallel>, #tpu.dimension_semantics<arbitrary>], iteration_bounds = array<i64: 1, 2>, scalar_prefetch = 0 : i64, scratch_operands = 3 : i64, tpu.core_type = #tpu.core_type<tc>, window_params = [{transform_indices = @transform_0, window_bounds = array<i64: 16, 1>}, {transform_indices = @transform_1, window_bounds = array<i64: 16, 128>}, {transform_indices = @transform_2, window_bounds = array<i64: 128, 512>}, {transform_indices = @transform_3, window_bounds = array<i64: 128, 512>}, {transform_indices = @transform_4, window_bounds = array<i64: 16, 1>}]} {
    %c0_i32 = arith.constant 0 : i32
    %0 = arith.cmpi eq, %arg1, %c0_i32 : i32
    %1 = arith.extui %0 : i1 to i32
    %c0_i32_0 = arith.constant 0 : i32
    %2 = arith.cmpi ne, %1, %c0_i32_0 : i32
    scf.if %2 {
      %cst = arith.constant 0xFF800000 : f32
      %17 = vector.broadcast %cst : f32 to vector<16x1xf32>
      %c0 = arith.constant 0 : index
      %c0_9 = arith.constant 0 : index
      %18 = vector.load %arg7[%c0, %c0_9] : memref<16x1xf32, #tpu.memory_space<vmem>>, vector<16x1xf32>
      tpu.vector_store %arg7[%c0, %c0_9], %17 {strides = array<i32>} : memref<16x1xf32, #tpu.memory_space<vmem>>, vector<16x1xf32>,
      %cst_10 = arith.constant 0.000000e+00 : f32
      %19 = vector.broadcast %cst_10 : f32 to vector<16x1xf32>
      %c0_11 = arith.constant 0 : index
      %c0_12 = arith.constant 0 : index
      %20 = vector.load %arg8[%c0_11, %c0_12] : memref<16x1xf32, #tpu.memory_space<vmem>>, vector<16x1xf32>
      tpu.vector_store %arg8[%c0_11, %c0_12], %19 {strides = array<i32>} : memref<16x1xf32, #tpu.memory_space<vmem>>, vector<16x1xf32>,
      %cst_13 = arith.constant 0.000000e+00 : f32
      %21 = vector.broadcast %cst_13 : f32 to vector<16x1xf32>
      %c0_14 = arith.constant 0 : index
      %c0_15 = arith.constant 0 : index
      %22 = vector.load %arg9[%c0_14, %c0_15] : memref<16x1xf32, #tpu.memory_space<vmem>>, vector<16x1xf32>
      tpu.vector_store %arg9[%c0_14, %c0_15], %21 {strides = array<i32>} : memref<16x1xf32, #tpu.memory_space<vmem>>, vector<16x1xf32>,
    } else {
    }
    %c0_i32_1 = arith.constant 0 : i32
    %3 = arith.cmpi slt, %arg1, %c0_i32_1 : i32
    %4 = arith.extui %3 : i1 to i32
    %c0_i32_2 = arith.constant 0 : i32
    %5 = arith.cmpi ne, %4, %c0_i32_2 : i32
    scf.if %5 {
      %c0 = arith.constant 0 : index
      %c0_9 = arith.constant 0 : index
      %17 = vector.load %arg3[%c0, %c0_9] : memref<16x128xbf16, #tpu.memory_space<vmem>>, vector<16x128xbf16>
      %c0_10 = arith.constant 0 : index
      %c0_11 = arith.constant 0 : index
      %18 = vector.load %arg4[%c0_10, %c0_11] : memref<128x512xbf16, #tpu.memory_space<vmem>>, vector<128x512xbf16>
      %cst = arith.constant dense<0.000000e+00> : vector<16x512xf32>
      %19 = tpu.matmul %17, %18, %cst {dimension_numbers = #tpu.dot_dimension_numbers<[1], [0], [0], [1], [0, 0, 1, 1], [], []>} : vector<16x128xbf16>, vector<128x512xbf16>, vector<16x512xf32> -> vector<16x512xf32>
      %20 = tpu.iota {dimensions = array<i32: 1>} : vector<16x512xi32>
      %c512_i32 = arith.constant 512 : i32
      %21 = arith.muli %arg1, %c512_i32 : i32
      %22 = vector.broadcast %21 : i32 to vector<16x512xi32>
      %23 = arith.addi %22, %20 : vector<16x512xi32>
      %c0_12 = arith.constant 0 : index
      %c0_13 = arith.constant 0 : index
      %24 = vector.load %arg2[%c0_12, %c0_13] : memref<16x1xi32, #tpu.memory_space<vmem>>, vector<16x1xi32>
      %25 = vector.broadcast %24 : vector<16x1xi32> to vector<16x512xi32>
      %26 = arith.cmpi eq, %23, %25 : vector<16x512xi32>
      %c0_14 = arith.constant 0 : index
      %c0_15 = arith.constant 0 : index
      %27 = vector.load %arg9[%c0_14, %c0_15] : memref<16x1xf32, #tpu.memory_space<vmem>>, vector<16x1xf32>
      %cst_16 = arith.constant 0.000000e+00 : f32
      %28 = vector.broadcast %cst_16 : f32 to vector<16x512xf32>
      %29 = arith.select %26, %19, %28 : vector<16x512xi1>, vector<16x512xf32>
      %cst_17 = arith.constant dense<0.000000e+00> : vector<16xf32>
      %30 = vector.multi_reduction <add>, %29, %cst_17 [1] : vector<16x512xf32> to vector<16xf32>
      %31 = vector.shape_cast %30 : vector<16xf32> to vector<16x1xf32>
      %32 = arith.addf %27, %31 : vector<16x1xf32>
      %c0_18 = arith.constant 0 : index
      %c0_19 = arith.constant 0 : index
      %33 = vector.load %arg9[%c0_18, %c0_19] : memref<16x1xf32, #tpu.memory_space<vmem>>, vector<16x1xf32>
      tpu.vector_store %arg9[%c0_18, %c0_19], %32 {strides = array<i32>} : memref<16x1xf32, #tpu.memory_space<vmem>>, vector<16x1xf32>,
      %c0_20 = arith.constant 0 : index
      %c0_21 = arith.constant 0 : index
      %34 = vector.load %arg7[%c0_20, %c0_21] : memref<16x1xf32, #tpu.memory_space<vmem>>, vector<16x1xf32>
      %cst_22 = arith.constant dense<0xFF800000> : vector<16xf32>
      %35 = vector.multi_reduction <maximumf>, %19, %cst_22 [1] : vector<16x512xf32> to vector<16xf32>
      %36 = vector.shape_cast %35 : vector<16xf32> to vector<16x1xf32>
      %37 = arith.maximumf %34, %36 : vector<16x1xf32>
      %38 = arith.subf %34, %37 : vector<16x1xf32>
      %39 = math.exp %38 : vector<16x1xf32>
      %c0_23 = arith.constant 0 : index
      %c0_24 = arith.constant 0 : index
      %40 = vector.load %arg8[%c0_23, %c0_24] : memref<16x1xf32, #tpu.memory_space<vmem>>, vector<16x1xf32>
      %41 = arith.mulf %39, %40 : vector<16x1xf32>
      %42 = vector.broadcast %37 : vector<16x1xf32> to vector<16x512xf32>
      %43 = arith.subf %19, %42 : vector<16x512xf32>
      %44 = math.exp %43 : vector<16x512xf32>
      %cst_25 = arith.constant dense<0.000000e+00> : vector<16xf32>
      %45 = vector.multi_reduction <add>, %44, %cst_25 [1] : vector<16x512xf32> to vector<16xf32>
      %46 = vector.shape_cast %45 : vector<16xf32> to vector<16x1xf32>
      %47 = arith.addf %41, %46 : vector<16x1xf32>
      %c0_26 = arith.constant 0 : index
      %c0_27 = arith.constant 0 : index
      %48 = vector.load %arg8[%c0_26, %c0_27] : memref<16x1xf32, #tpu.memory_space<vmem>>, vector<16x1xf32>
      tpu.vector_store %arg8[%c0_26, %c0_27], %47 {strides = array<i32>} : memref<16x1xf32, #tpu.memory_space<vmem>>, vector<16x1xf32>,
      %c0_28 = arith.constant 0 : index
      %c0_29 = arith.constant 0 : index
      %49 = vector.load %arg7[%c0_28, %c0_29] : memref<16x1xf32, #tpu.memory_space<vmem>>, vector<16x1xf32>
      tpu.vector_store %arg7[%c0_28, %c0_29], %37 {strides = array<i32>} : memref<16x1xf32, #tpu.memory_space<vmem>>, vector<16x1xf32>,
    } else {
    }
    %c0_i32_3 = arith.constant 0 : i32
    %6 = arith.cmpi eq, %arg1, %c0_i32_3 : i32
    %7 = arith.extui %6 : i1 to i32
    %c0_i32_4 = arith.constant 0 : i32
    %8 = arith.cmpi ne, %7, %c0_i32_4 : i32
    scf.if %8 {
      %c0 = arith.constant 0 : index
      %c0_9 = arith.constant 0 : index
      %17 = vector.load %arg3[%c0, %c0_9] : memref<16x128xbf16, #tpu.memory_space<vmem>>, vector<16x128xbf16>
      %c0_10 = arith.constant 0 : index
      %c0_11 = arith.constant 0 : index
      %18 = vector.load %arg4[%c0_10, %c0_11] : memref<128x512xbf16, #tpu.memory_space<vmem>>, vector<128x512xbf16>
      %cst = arith.constant dense<0.000000e+00> : vector<16x512xf32>
      %19 = tpu.matmul %17, %18, %cst {dimension_numbers = #tpu.dot_dimension_numbers<[1], [0], [0], [1], [0, 0, 1, 1], [], []>} : vector<16x128xbf16>, vector<128x512xbf16>, vector<16x512xf32> -> vector<16x512xf32>
      %20 = tpu.iota {dimensions = array<i32: 1>} : vector<16x512xi32>
      %c250_i32 = arith.constant 250 : i32
      %21 = vector.broadcast %c250_i32 : i32 to vector<16x512xi32>
      %22 = arith.cmpi slt, %20, %21 : vector<16x512xi32>
      %cst_12 = arith.constant -1.000000e+30 : f32
      %23 = vector.broadcast %cst_12 : f32 to vector<16x512xf32>
      %24 = arith.select %22, %19, %23 : vector<16x512xi1>, vector<16x512xf32>
      %c512_i32 = arith.constant 512 : i32
      %25 = arith.muli %arg1, %c512_i32 : i32
      %26 = vector.broadcast %25 : i32 to vector<16x512xi32>
      %27 = arith.addi %26, %20 : vector<16x512xi32>
      %c0_13 = arith.constant 0 : index
      %c0_14 = arith.constant 0 : index
      %28 = vector.load %arg2[%c0_13, %c0_14] : memref<16x1xi32, #tpu.memory_space<vmem>>, vector<16x1xi32>
      %29 = vector.broadcast %28 : vector<16x1xi32> to vector<16x512xi32>
      %30 = arith.cmpi eq, %27, %29 : vector<16x512xi32>
      %c0_15 = arith.constant 0 : index
      %c0_16 = arith.constant 0 : index
      %31 = vector.load %arg9[%c0_15, %c0_16] : memref<16x1xf32, #tpu.memory_space<vmem>>, vector<16x1xf32>
      %cst_17 = arith.constant 0.000000e+00 : f32
      %32 = vector.broadcast %cst_17 : f32 to vector<16x512xf32>
      %33 = arith.select %30, %24, %32 : vector<16x512xi1>, vector<16x512xf32>
      %cst_18 = arith.constant dense<0.000000e+00> : vector<16xf32>
      %34 = vector.multi_reduction <add>, %33, %cst_18 [1] : vector<16x512xf32> to vector<16xf32>
      %35 = vector.shape_cast %34 : vector<16xf32> to vector<16x1xf32>
      %36 = arith.addf %31, %35 : vector<16x1xf32>
      %c0_19 = arith.constant 0 : index
      %c0_20 = arith.constant 0 : index
      %37 = vector.load %arg9[%c0_19, %c0_20] : memref<16x1xf32, #tpu.memory_space<vmem>>, vector<16x1xf32>
      tpu.vector_store %arg9[%c0_19, %c0_20], %36 {strides = array<i32>} : memref<16x1xf32, #tpu.memory_space<vmem>>, vector<16x1xf32>,
      %c0_21 = arith.constant 0 : index
      %c0_22 = arith.constant 0 : index
      %38 = vector.load %arg7[%c0_21, %c0_22] : memref<16x1xf32, #tpu.memory_space<vmem>>, vector<16x1xf32>
      %cst_23 = arith.constant dense<0xFF800000> : vector<16xf32>
      %39 = vector.multi_reduction <maximumf>, %24, %cst_23 [1] : vector<16x512xf32> to vector<16xf32>
      %40 = vector.shape_cast %39 : vector<16xf32> to vector<16x1xf32>
      %41 = arith.maximumf %38, %40 : vector<16x1xf32>
      %42 = arith.subf %38, %41 : vector<16x1xf32>
      %43 = math.exp %42 : vector<16x1xf32>
      %c0_24 = arith.constant 0 : index
      %c0_25 = arith.constant 0 : index
      %44 = vector.load %arg8[%c0_24, %c0_25] : memref<16x1xf32, #tpu.memory_space<vmem>>, vector<16x1xf32>
      %45 = arith.mulf %43, %44 : vector<16x1xf32>
      %46 = vector.broadcast %41 : vector<16x1xf32> to vector<16x512xf32>
      %47 = arith.subf %24, %46 : vector<16x512xf32>
      %48 = math.exp %47 : vector<16x512xf32>
      %cst_26 = arith.constant dense<0.000000e+00> : vector<16xf32>
      %49 = vector.multi_reduction <add>, %48, %cst_26 [1] : vector<16x512xf32> to vector<16xf32>
      %50 = vector.shape_cast %49 : vector<16xf32> to vector<16x1xf32>
      %51 = arith.addf %45, %50 : vector<16x1xf32>
      %c0_27 = arith.constant 0 : index
      %c0_28 = arith.constant 0 : index
      %52 = vector.load %arg8[%c0_27, %c0_28] : memref<16x1xf32, #tpu.memory_space<vmem>>, vector<16x1xf32>
      tpu.vector_store %arg8[%c0_27, %c0_28], %51 {strides = array<i32>} : memref<16x1xf32, #tpu.memory_space<vmem>>, vector<16x1xf32>,
      %c0_29 = arith.constant 0 : index
      %c0_30 = arith.constant 0 : index
      %53 = vector.load %arg7[%c0_29, %c0_30] : memref<16x1xf32, #tpu.memory_space<vmem>>, vector<16x1xf32>
      tpu.vector_store %arg7[%c0_29, %c0_30], %41 {strides = array<i32>} : memref<16x1xf32, #tpu.memory_space<vmem>>, vector<16x1xf32>,
    } else {
    }
    %c1_i32 = arith.constant 1 : i32
    %9 = arith.cmpi sge, %arg1, %c1_i32 : i32
    %c1_i32_5 = arith.constant 1 : i32
    %10 = arith.cmpi slt, %arg1, %c1_i32_5 : i32
    %11 = arith.andi %9, %10 : i1
    %12 = arith.extui %11 : i1 to i32
    %c0_i32_6 = arith.constant 0 : i32
    %13 = arith.cmpi ne, %12, %c0_i32_6 : i32
    scf.if %13 {
      %c0 = arith.constant 0 : index
      %c0_9 = arith.constant 0 : index
      %17 = vector.load %arg3[%c0, %c0_9] : memref<16x128xbf16, #tpu.memory_space<vmem>>, vector<16x128xbf16>
      %c0_10 = arith.constant 0 : index
      %c0_11 = arith.constant 0 : index
      %18 = vector.load %arg5[%c0_10, %c0_11] : memref<128x512xbf16, #tpu.memory_space<vmem>>, vector<128x512xbf16>
      %cst = arith.constant dense<0.000000e+00> : vector<16x512xf32>
      %19 = tpu.matmul %17, %18, %cst {dimension_numbers = #tpu.dot_dimension_numbers<[1], [0], [0], [1], [0, 0, 1, 1], [], []>} : vector<16x128xbf16>, vector<128x512xbf16>, vector<16x512xf32> -> vector<16x512xf32>
      %c0_12 = arith.constant 0 : index
      %c0_13 = arith.constant 0 : index
      %20 = vector.load %arg7[%c0_12, %c0_13] : memref<16x1xf32, #tpu.memory_space<vmem>>, vector<16x1xf32>
      %cst_14 = arith.constant dense<0xFF800000> : vector<16xf32>
      %21 = vector.multi_reduction <maximumf>, %19, %cst_14 [1] : vector<16x512xf32> to vector<16xf32>
      %22 = vector.shape_cast %21 : vector<16xf32> to vector<16x1xf32>
      %23 = arith.maximumf %20, %22 : vector<16x1xf32>
      %24 = arith.subf %20, %23 : vector<16x1xf32>
      %25 = math.exp %24 : vector<16x1xf32>
      %c0_15 = arith.constant 0 : index
      %c0_16 = arith.constant 0 : index
      %26 = vector.load %arg8[%c0_15, %c0_16] : memref<16x1xf32, #tpu.memory_space<vmem>>, vector<16x1xf32>
      %27 = arith.mulf %25, %26 : vector<16x1xf32>
      %28 = vector.broadcast %23 : vector<16x1xf32> to vector<16x512xf32>
      %29 = arith.subf %19, %28 : vector<16x512xf32>
      %30 = math.exp %29 : vector<16x512xf32>
      %cst_17 = arith.constant dense<0.000000e+00> : vector<16xf32>
      %31 = vector.multi_reduction <add>, %30, %cst_17 [1] : vector<16x512xf32> to vector<16xf32>
      %32 = vector.shape_cast %31 : vector<16xf32> to vector<16x1xf32>
      %33 = arith.addf %27, %32 : vector<16x1xf32>
      %c0_18 = arith.constant 0 : index
      %c0_19 = arith.constant 0 : index
      %34 = vector.load %arg8[%c0_18, %c0_19] : memref<16x1xf32, #tpu.memory_space<vmem>>, vector<16x1xf32>
      tpu.vector_store %arg8[%c0_18, %c0_19], %33 {strides = array<i32>} : memref<16x1xf32, #tpu.memory_space<vmem>>, vector<16x1xf32>,
      %c0_20 = arith.constant 0 : index
      %c0_21 = arith.constant 0 : index
      %35 = vector.load %arg7[%c0_20, %c0_21] : memref<16x1xf32, #tpu.memory_space<vmem>>, vector<16x1xf32>
      tpu.vector_store %arg7[%c0_20, %c0_21], %23 {strides = array<i32>} : memref<16x1xf32, #tpu.memory_space<vmem>>, vector<16x1xf32>,
    } else {
    }
    %c1_i32_7 = arith.constant 1 : i32
    %14 = arith.cmpi eq, %arg1, %c1_i32_7 : i32
    %15 = arith.extui %14 : i1 to i32
    %c0_i32_8 = arith.constant 0 : i32
    %16 = arith.cmpi ne, %15, %c0_i32_8 : i32
    scf.if %16 {
      %c0 = arith.constant 0 : index
      %c0_9 = arith.constant 0 : index
      %17 = vector.load %arg3[%c0, %c0_9] : memref<16x128xbf16, #tpu.memory_space<vmem>>, vector<16x128xbf16>
      %c0_10 = arith.constant 0 : index
      %c0_11 = arith.constant 0 : index
      %18 = vector.load %arg5[%c0_10, %c0_11] : memref<128x512xbf16, #tpu.memory_space<vmem>>, vector<128x512xbf16>
      %cst = arith.constant dense<0.000000e+00> : vector<16x512xf32>
      %19 = tpu.matmul %17, %18, %cst {dimension_numbers = #tpu.dot_dimension_numbers<[1], [0], [0], [1], [0, 0, 1, 1], [], []>} : vector<16x128xbf16>, vector<128x512xbf16>, vector<16x512xf32> -> vector<16x512xf32>
      %20 = tpu.iota {dimensions = array<i32: 1>} : vector<16x512xi32>
      %c300_i32 = arith.constant 300 : i32
      %21 = vector.broadcast %c300_i32 : i32 to vector<16x512xi32>
      %22 = arith.cmpi slt, %20, %21 : vector<16x512xi32>
      %cst_12 = arith.constant -1.000000e+30 : f32
      %23 = vector.broadcast %cst_12 : f32 to vector<16x512xf32>
      %24 = arith.select %22, %19, %23 : vector<16x512xi1>, vector<16x512xf32>
      %c0_13 = arith.constant 0 : index
      %c0_14 = arith.constant 0 : index
      %25 = vector.load %arg7[%c0_13, %c0_14] : memref<16x1xf32, #tpu.memory_space<vmem>>, vector<16x1xf32>
      %cst_15 = arith.constant dense<0xFF800000> : vector<16xf32>
      %26 = vector.multi_reduction <maximumf>, %24, %cst_15 [1] : vector<16x512xf32> to vector<16xf32>
      %27 = vector.shape_cast %26 : vector<16xf32> to vector<16x1xf32>
      %28 = arith.maximumf %25, %27 : vector<16x1xf32>
      %29 = arith.subf %25, %28 : vector<16x1xf32>
      %30 = math.exp %29 : vector<16x1xf32>
      %c0_16 = arith.constant 0 : index
      %c0_17 = arith.constant 0 : index
      %31 = vector.load %arg8[%c0_16, %c0_17] : memref<16x1xf32, #tpu.memory_space<vmem>>, vector<16x1xf32>
      %32 = arith.mulf %30, %31 : vector<16x1xf32>
      %33 = vector.broadcast %28 : vector<16x1xf32> to vector<16x512xf32>
      %34 = arith.subf %24, %33 : vector<16x512xf32>
      %35 = math.exp %34 : vector<16x512xf32>
      %cst_18 = arith.constant dense<0.000000e+00> : vector<16xf32>
      %36 = vector.multi_reduction <add>, %35, %cst_18 [1] : vector<16x512xf32> to vector<16xf32>
      %37 = vector.shape_cast %36 : vector<16xf32> to vector<16x1xf32>
      %38 = arith.addf %32, %37 : vector<16x1xf32>
      %c0_19 = arith.constant 0 : index
      %c0_20 = arith.constant 0 : index
      %39 = vector.load %arg8[%c0_19, %c0_20] : memref<16x1xf32, #tpu.memory_space<vmem>>, vector<16x1xf32>
      tpu.vector_store %arg8[%c0_19, %c0_20], %38 {strides = array<i32>} : memref<16x1xf32, #tpu.memory_space<vmem>>, vector<16x1xf32>,
      %c0_21 = arith.constant 0 : index
      %c0_22 = arith.constant 0 : index
      %40 = vector.load %arg7[%c0_21, %c0_22] : memref<16x1xf32, #tpu.memory_space<vmem>>, vector<16x1xf32>
      tpu.vector_store %arg7[%c0_21, %c0_22], %28 {strides = array<i32>} : memref<16x1xf32, #tpu.memory_space<vmem>>, vector<16x1xf32>,
      %c0_23 = arith.constant 0 : index
      %c0_24 = arith.constant 0 : index
      %41 = vector.load %arg7[%c0_23, %c0_24] : memref<16x1xf32, #tpu.memory_space<vmem>>, vector<16x1xf32>
      %c0_25 = arith.constant 0 : index
      %c0_26 = arith.constant 0 : index
      %42 = vector.load %arg8[%c0_25, %c0_26] : memref<16x1xf32, #tpu.memory_space<vmem>>, vector<16x1xf32>
      %43 = math.log %42 : vector<16x1xf32>
      %44 = arith.addf %41, %43 : vector<16x1xf32>
      %c0_27 = arith.constant 0 : index
      %c0_28 = arith.constant 0 : index
      %45 = vector.load %arg9[%c0_27, %c0_28] : memref<16x1xf32, #tpu.memory_space<vmem>>, vector<16x1xf32>
      %46 = arith.subf %44, %45 : vector<16x1xf32>
      %c0_29 = arith.constant 0 : index
      %c0_30 = arith.constant 0 : index
      %47 = vector.load %arg6[%c0_29, %c0_30] : memref<16x1xf32, #tpu.memory_space<vmem>>, vector<16x1xf32>
      tpu.vector_store %arg6[%c0_29, %c0_30], %46 {strides = array<i32>} : memref<16x1xf32, #tpu.memory_space<vmem>>, vector<16x1xf32>,
    } else {
    }
    return
  }
  func.func @transform_0(%arg0: i32, %arg1: i32) -> (i32, i32) {
    %c0_i32 = arith.constant 0 : i32
    %c0_i32_0 = arith.constant 0 : i32
    return %arg0, %c0_i32 : i32, i32
  }
  func.func @transform_1(%arg0: i32, %arg1: i32) -> (i32, i32) {
    %c0_i32 = arith.constant 0 : i32
    %c0_i32_0 = arith.constant 0 : i32
    return %arg0, %c0_i32 : i32, i32
  }
  func.func @transform_2(%arg0: i32, %arg1: i32) -> (i32, i32) {
    %c0_i32 = arith.constant 0 : i32
    %0 = arith.minsi %arg1, %c0_i32 : i32
    %c0_i32_0 = arith.constant 0 : i32
    %c0_i32_1 = arith.constant 0 : i32
    return %c0_i32_0, %0 : i32, i32
  }
  func.func @transform_3(%arg0: i32, %arg1: i32) -> (i32, i32) {
    %c1_i32 = arith.constant 1 : i32
    %0 = arith.subi %arg1, %c1_i32 : i32
    %c0_i32 = arith.constant 0 : i32
    %1 = arith.maxsi %0, %c0_i32 : i32
    %c0_i32_0 = arith.constant 0 : i32
    %c0_i32_1 = arith.constant 0 : i32
    return %c0_i32_0, %1 : i32, i32
  }
  func.func @transform_4(%arg0: i32, %arg1: i32) -> (i32, i32) {
    %c0_i32 = arith.constant 0 : i32
    %c0_i32_0 = arith.constant 0 : i32
    return %arg0, %c0_i32 : i32, i32
  }
}

</mosaic_0001>

<bundles_post_ra>
// kernel: tpu_custom_call.1
= control target key start
LH: loop header
LB: loop body
LE: loop exit
PB: predicated region body
PF: predicated region fallthrough
CT: control target
= control target key end

     0   :  { %9 = vsyncpa [#allocation6], 0  ;;  %s3240_s0 = inlined_call_operand.vmem [shape: s32[16,1], index: 0, kind: input, shape index: {}]   ;;  %s3241_s1 = inlined_call_operand.vmem [shape: bf16[16,128], index: 1, kind: input, shape index: {}]   ;;  %s3242_s2 = inlined_call_operand.hbm [shape: bf16[128,512], index: 2, kind: input, shape index: {}]   ;;  %s3243_s3 = inlined_call_operand.hbm [shape: bf16[128,512], index: 3, kind: input, shape index: {}]   ;;  %s3244_s4 = inlined_call_operand.vmem [shape: f32[16,1], index: 4, kind: output, shape index: {}]  }
   0x1   :  { %11 = vsyncpa [#allocation6 + $0x1], 0 }
   0x2   :  { %12 = vsyncpa [#allocation8], 0 }
   0x3   :  { %14 = vsyncpa [#allocation8 + $0x1], 0  ;;  %s2791_s15 = smov 0   ;;  %s2793_s16 = smov 0  }
   0x4   :  { %s2795_s17 = smov 0   ;;  %s2797_s18 = smov 0  }
   0x5   :  { %s2799_s19 = smov 0   ;;  %s2801_s20 = smov 0  }
   0x6   :  { %s2803_s21 = smov 0  }
   0x7 LB: > { %s2083_s22 = sadd.s32 4294967295, %s2753_s21   ;;  %s29_s23 = sadd.s32 1, %s2749_s20  ;;  %s2753_s21 = sphi %s2803_s21, %s20_s21   ;;  %s2749_s20 = sphi %s2801_s20, %s3269_s20   ;;  %s2745_s19 = sphi %s2799_s19, %s3268_s19   ;;  %s2741_s18 = sphi %s2797_s18, %s3230_s18   ;;  %s2737_s17 = sphi %s2795_s17, %s3267_s17   ;;  %s2733_s16 = sphi %s2793_s16, %s3225_s16   ;;  %s2729_s15 = sphi %s2791_s15, %s3266_s15  }
   0x8   : > { %p30_p0 = scmp.ge.s32.totalorder %s29_s23, 2  ;;  %p2725_p1 = scmp.ne.s32.totalorder %s2741_s18, 0 }
   0x9   : > { %p3246_p2 = scmp.eq.s32.totalorder %s2753_s21, 0  ;;  %p108_p3 = scmp.ne.s32.totalorder %s2741_s18, %s2737_s17 }
   0xa   : > { %s3271_s23 = smov (%p30_p0, %s29_s23), 0  ;;  %p2831_p4 = scmp.eq.s32.totalorder %s2083_s22, 0 }
   0xb   : > { %p104_p5 = por %p2725_p1, %p3246_p2  ;;  %p3245_p7 = scmp.lt.s32.totalorder %s2753_s21, 2 }
   0xc   : > { %s3252_s24 = scalar_select %p2831_p4, 1, 0 }
   0xd   : > { %p2839_p6 = por %p2831_p4, %p108_p3  ;;  %s2755_s26 = smov [#allocation5]  }
   0xe   : > { %s221_s27 = sshll.u32 %s2755_s26, 4  ;;  %p2846_p8 = pnand %p3245_p7, %p104_p5  ;;  %s222_s27 = int_to_ptr.vmem [resolvable:$true] %s221_s27 }
   0xf   : > { %s3253_s25 = scalar_select %p2839_p6, 1, 0 }
  0x10   : > { %s3254_s28 = scalar_select %p2846_p8, 1, 0 }
  0x11   : > { %s2621_s5 = scalar_lea.hbm %s3242_s2, 4096  ;;  %p2623_p10 = pneg %p2846_p8 }
  0x12   : > { %p2622_p9 = scmp.ne.s32.totalorder %s3242_s2, %s2621_s5  ;;  %p2628_p13 = scmp.lt.u32.totalorder %s2621_s5, %s2621_s5 }
  0x13   : > { %p2630_p0 = scmp.lt.u32.totalorder %s2621_s5, %s3242_s2 }
  0x14   : > { %p2624_p11 = pnand %p2623_p10, %p2622_p9 }
  0x15   : > { %p2631_p1 = por %p2630_p0, %p2628_p13 }
  0x16   : > { %p2625_p12 = pneg %p2624_p11 }
  0x18   : > { %p2632_p3 = pnand %p2631_p1, %p2625_p12 }
  0x1a   : > { %2635 = shalt.err (!%p2632_p3)
}
  0x1b   : > { %s2636_s10 = scalar_lea.vmem %s222_s27, 4096  ;;  %s2643_s11 = scalar_lea.vmem %s222_s27, 8192 }
  0x1c   : > { %p2637_p5 = scmp.ne.s32.totalorder %s222_s27, %s2636_s10  ;;  %p2644_p6 = scmp.lt.s32.totalorder %s222_s27, %s222_s27 }
  0x1d   : > { %p2645_p4 = scmp.lt.s32.totalorder %s2643_s11, %s2636_s10 }
  0x1e   : > { %p2639_p7 = pnand %p2637_p5, %p2623_p10 }
  0x1f   : > { %p2646_p8 = por %p2645_p4, %p2644_p6 }
  0x20   : > { %p2640_p2 = pneg %p2639_p7 }
  0x22   : > { %p2647_p9 = pnand %p2646_p8, %p2640_p2 }
  0x24   : > { %2650 = shalt.err (!%p2647_p9)
}
  0x25   : > { %s2756_s12 = smov 256   ;;  %s2757_s13 = smov 16  }
  0x26   : > { %p3255_p11 = scmp.ne.s32.totalorder %s3254_s28, 0  ;;  %p2097_p2 = scmp.ge.s32.totalorder %s2753_s21, 1 }
  0x27   : > { %p253_p4 = scmp.lt.s32.totalorder %s2753_s21, 3  ;;  %p2726_p7 = scmp.ne.s32.totalorder %s2733_s16, 0 }
  0x28   : > { %2251 = dma.hbm_to_vmem [thread:$0]  (!%p3255_p11), %s3242_s2, 4096, %s222_s27, [#allocation6], %s2756_s12, %s2756_s12, %s2757_s13  }
  0x29   : > { %p2871_p6 = pnand %p2097_p2, %p253_p4  ;;  %p140_p8 = scmp.ne.s32.totalorder %s2733_s16, %s2729_s15 }
  0x2a   : > { %p3257_p10 = scmp.eq.s32.totalorder %s2753_s21, 0  ;;  %p3258_p13 = scmp.ne.s32.totalorder %s3252_s24, 0 }
  0x2b   : > { %s3256_s22 = scalar_select %p2871_p6, 1, 0 }
  0x2c   : > { %p136_p12 = por %p2726_p7, %p3257_p10  ;;  %p2882_p0 = por %p140_p8, %p3258_p13 }
  0x2d   : > { %s2758_s28 = smov [#allocation7]   ;;  %p3260_p1 = scmp.lt.s32.totalorder %s2753_s21, 2 }
  0x2e   : > { %s3259_s26 = scalar_select %p2882_p0, 1, 0 }
  0x2f   : > { %s245_s29 = sshll.u32 %s2758_s28, 4  ;;  %p2888_p3 = pnand %p3260_p1, %p136_p12  ;;  %s246_s29 = int_to_ptr.vmem [resolvable:$true] %s245_s29 }
  0x30   : > { %s2651_s15 = scalar_lea.hbm %s3243_s3, 4096 }
  0x31   : > { %s3261_s27 = scalar_select %p2888_p3, 1, 0 }
  0x32   : > { %p2652_p5 = scmp.ne.s32.totalorder %s3243_s3, %s2651_s15  ;;  %p2653_p9 = pneg %p2888_p3 }
  0x33   : > { %p2658_p4 = scmp.lt.u32.totalorder %s2651_s15, %s2651_s15  ;;  %p2660_p7 = scmp.lt.u32.totalorder %s2651_s15, %s3243_s3 }
  0x34   : > { %p2654_p11 = pnand %p2653_p9, %p2652_p5 }
  0x35   : > { %p2661_p8 = por %p2660_p7, %p2658_p4 }
  0x36   : > { %p2655_p2 = pneg %p2654_p11 }
  0x38   : > { %p2662_p10 = pnand %p2661_p8, %p2655_p2 }
  0x3a   : > { %2665 = shalt.err (!%p2662_p10)
}
  0x3b   : > { %s2666_s9 = scalar_lea.vmem %s246_s29, 4096  ;;  %s2673_s10 = scalar_lea.vmem %s246_s29, 8192 }
  0x3c   : > { %p2667_p12 = scmp.ne.s32.totalorder %s246_s29, %s2666_s9  ;;  %p2674_p0 = scmp.lt.s32.totalorder %s246_s29, %s246_s29 }
  0x3d   : > { %p2675_p6 = scmp.lt.s32.totalorder %s2673_s10, %s2666_s9 }
  0x3e   : > { %p2669_p13 = pnand %p2667_p12, %p2653_p9 }
  0x3f   : > { %p2676_p3 = por %p2675_p6, %p2674_p0 }
  0x40   : > { %p2670_p1 = pneg %p2669_p13 }
  0x42   : > { %p2677_p5 = pnand %p2676_p3, %p2670_p1 }
  0x44   : > { %2680 = shalt.err (!%p2677_p5)
}
  0x45   : > { %p3262_p11 = scmp.ne.s32.totalorder %s3261_s27, 0  ;;  %p3263_p2 = scmp.ne.s32.totalorder %s3256_s22, 0 }
  0x46   : > { %s259_s17 = sand.u32 (!%p3263_p2), 1, %s2741_s18   ;;  %p3264_p6 = scmp.ne.s32.totalorder (!%p3263_p2), %s3253_s25, 0 }
  0x47   : > { %2254 = dma.hbm_to_vmem [thread:$0]  (!%p3262_p11), %s3243_s3, 4096, %s246_s29, [#allocation8], %s2756_s12, %s2756_s12, %s2757_s13  }
  0x48   : > { %257 = sbr.rel (%p3263_p2) target bundleno = 2903 (0xb57), region = 36  ;;  %s2098_s28 = sshll.u32 (!%p3263_p2), %s259_s17, 8 }
  0x49   : > { %s260_s30 = scalar_lea.sflag (!%p3263_p2), [#allocation6], %s259_s17  ;;  %s2914_s5 = scalar_lea.vmem (!%p3263_p2), [#allocation5], %s2098_s28 }
  0x4f   : > { %2718 = dma.done.wait (%p3264_p6), %s260_s30, 4096  }
  0x50   : > { %2720 = vsyncadd (%p3264_p6), %s260_s30, 4294963200  ;;  %s268_s27 = sand.u32 1, %s2733_s16   ;;  %p3265_p0 = scmp.ne.s32.totalorder %s3259_s26, 0 }
  0x51   : > { %s2099_s15 = sshll.u32 %s268_s27, 8  ;;  %s269_s12 = scalar_lea.sflag [#allocation8], %s268_s27 }
  0x52   : > { %s2921_s13 = scalar_lea.vmem [#allocation7], %s2099_s15 }
  0x53   : > { %2722 = dma.done.wait (%p3265_p0), %s269_s12, 4096  }
  0x54   : > { %2724 = vsyncadd (%p3265_p0), %s269_s12, 4294963200  ;;  %p2100_p3 = scmp.ne.s32.totalorder %s2745_s19, 0 }
  0x55   : > { %vm342_vm0 = vcmask (!%p2100_p3), 7168   ;;  %v2759_v0 = vmov (!%p2100_p3), -inf   ;;  %v2760_v1 = vmov (!%p2100_p3), 0.0  }
  0x56   : > { %341 = sbr.rel (%p2100_p3) target bundleno = 93 (0x5d), region = 48  ;;  %343 = vst.msk [vmem:[#allocation2] sm:$0xff] (!%p2100_p3), %vm342_vm0, %v2759_v0  ;;  %344 = vst.msk [vmem:[#allocation2 + $0x8] sm:$0xff] (!%p2100_p3), %vm342_vm0, %v2759_v0 }
  0x57   : > { %345 = vst.msk [vmem:[#allocation3] sm:$0xff] (!%p2100_p3), %vm342_vm0, %v2760_v1  ;;  %346 = vst.msk [vmem:[#allocation3 + $0x8] sm:$0xff] (!%p2100_p3), %vm342_vm0, %v2760_v1 }
  0x58   : > { %347 = vst.msk [vmem:[#allocation4] sm:$0xff] (!%p2100_p3), %vm342_vm0, %v2760_v1  ;;  %348 = vst.msk [vmem:[#allocation4 + $0x8] sm:$0xff] (!%p2100_p3), %vm342_vm0, %v2760_v1 }
  0x5d PF: > { %p2101_p9 = scmp.ge.s32.totalorder %s2745_s19, 0 }
  0x5e   : > { %v2339_v2 = vld [vmem:[%s2914_s5 + $0x4] ss:$16 sps:$4 sm:$0xff] (!%p2101_p9)   ;;  %v2341_v3 = vld [vmem:[%s2914_s5 + $0xc] ss:$16 sps:$4 sm:$0xff] (!%p2101_p9)   ;;  %v2761_v4 = vmov (!%p2101_p9), 0   ;;  %v639_v51 = vlaneseq (!%p2101_p9)  ;;  %vm688_vm1 = vcmask (!%p2101_p9), 7168  }
  0x5f   : > { %352 = sbr.rel (%p2101_p9) target bundleno = 789 (0x315), region = 52  ;;  %585 = vmatprep.mubr.bf16.mxu0 (!%p2101_p9), %v2761_v4  ;;  %628 = vmatprep.mubr.bf16.mxu1 (!%p2101_p9), %v2761_v4  ;;  %v2343_v5 = vld [vmem:[%s2914_s5] ss:$16 sps:$4 sm:$0xff] (!%p2101_p9)   ;;  %v2344_v6 = vld [vmem:[%s2914_s5 + $0x8] ss:$16 sps:$4 sm:$0xff] (!%p2101_p9)   ;;  %s2135_s6 = sshll.u32 (!%p2101_p9), %s2745_s19, 9 }
  0x60   : > { %553 = vmatprep.subr.bf16.mxu0 (!%p2101_p9), %v2339_v2  ;;  %2338 = vset.pattern.permute.xlu0 (!%p2101_p9), %v2761_v4  ;;  %v2345_v7 = vld [vmem:[%s2914_s5 + $0x24] ss:$16 sps:$4 sm:$0xff] (!%p2101_p9)   ;;  %v2347_v8 = vld [vmem:[%s2914_s5 + $0x2c] ss:$16 sps:$4 sm:$0xff] (!%p2101_p9)   ;;  %v2349_v9 = vld [vmem:[%s2914_s5 + $0x20] ss:$16 sps:$4 sm:$0xff] (!%p2101_p9)   ;;  %v645_v62 = vstv (!%p2101_p9), %s2135_s6 }
  0x61   : > { %596 = vmatprep.subr.bf16.mxu1 (!%p2101_p9), %v2341_v3  ;;  %2337 = vset.pattern.permute.xlu1 (!%p2101_p9), %v2761_v4  ;;  %v2350_v10 = vld [vmem:[%s2914_s5 + $0x28] ss:$16 sps:$4 sm:$0xff] (!%p2101_p9)   ;;  %v2351_v11 = vld [vmem:[%s2914_s5 + $0x44] ss:$16 sps:$4 sm:$0xff] (!%p2101_p9)   ;;  %v2353_v12 = vld [vmem:[%s2914_s5 + $0x4c] ss:$16 sps:$4 sm:$0xff] (!%p2101_p9)  }
  0x62   : > { %554 = vmatpush1.bf16.msra.mxu0 (!%p2101_p9), %v2343_v5  ;;  %597 = vmatpush1.bf16.msra.mxu1 (!%p2101_p9), %v2344_v6  ;;  %v2355_v13 = vld [vmem:[%s2914_s5 + $0x40] ss:$16 sps:$4 sm:$0xff] (!%p2101_p9)   ;;  %v2356_v14 = vld [vmem:[%s2914_s5 + $0x48] ss:$16 sps:$4 sm:$0xff] (!%p2101_p9)   ;;  %v2357_v15 = vld [vmem:[%s2914_s5 + $0x64] ss:$16 sps:$4 sm:$0xff] (!%p2101_p9)  }
  0x63   : > { %555 = vmatprep.subr.bf16.mxu0 (!%p2101_p9), %v2345_v7  ;;  %598 = vmatprep.subr.bf16.mxu1 (!%p2101_p9), %v2347_v8  ;;  %v2359_v16 = vld [vmem:[%s2914_s5 + $0x6c] ss:$16 sps:$4 sm:$0xff] (!%p2101_p9)   ;;  %v2361_v17 = vld [vmem:[%s2914_s5 + $0x60] ss:$16 sps:$4 sm:$0xff] (!%p2101_p9)   ;;  %v2362_v18 = vld [vmem:[%s2914_s5 + $0x68] ss:$16 sps:$4 sm:$0xff] (!%p2101_p9)  }
  0x64   : > { %v2363_v19 = vld [vmem:[%s2914_s5 + $0x84] ss:$16 sps:$4 sm:$0xff] (!%p2101_p9)   ;;  %v2365_v20 = vld [vmem:[%s2914_s5 + $0x8c] ss:$16 sps:$4 sm:$0xff] (!%p2101_p9)   ;;  %v2367_v21 = vld [vmem:[%s2914_s5 + $0x80] ss:$16 sps:$4 sm:$0xff] (!%p2101_p9)  }
  0x65   : > { %v2368_v22 = vld [vmem:[%s2914_s5 + $0x88] ss:$16 sps:$4 sm:$0xff] (!%p2101_p9)   ;;  %v2369_v23 = vld [vmem:[%s2914_s5 + $0xa4] ss:$16 sps:$4 sm:$0xff] (!%p2101_p9)   ;;  %v2371_v24 = vld [vmem:[%s2914_s5 + $0xac] ss:$16 sps:$4 sm:$0xff] (!%p2101_p9)  }
  0x66   : > { %556 = vmatpush1.bf16.msra.mxu0 %v2349_v9  ;;  %599 = vmatpush1.bf16.msra.mxu1 %v2350_v10  ;;  %v2373_v25 = vld [vmem:[%s2914_s5 + $0xa0] ss:$16 sps:$4 sm:$0xff]   ;;  %v2374_v26 = vld [vmem:[%s2914_s5 + $0xa8] ss:$16 sps:$4 sm:$0xff]   ;;  %v2375_v27 = vld [vmem:[%s2914_s5 + $0xc4] ss:$16 sps:$4 sm:$0xff]  }
  0x67   : > { %557 = vmatprep.subr.bf16.mxu0 %v2351_v11  ;;  %600 = vmatprep.subr.bf16.mxu1 %v2353_v12  ;;  %v2377_v28 = vld [vmem:[%s2914_s5 + $0xcc] ss:$16 sps:$4 sm:$0xff]   ;;  %v2379_v29 = vld [vmem:[%s2914_s5 + $0xc0] ss:$16 sps:$4 sm:$0xff]   ;;  %v2380_v30 = vld [vmem:[%s2914_s5 + $0xc8] ss:$16 sps:$4 sm:$0xff]  }
  0x68   : > { %v2381_v31 = vld [vmem:[%s2914_s5 + $0xe4] ss:$16 sps:$4 sm:$0xff]   ;;  %v2383_v32 = vld [vmem:[%s2914_s5 + $0xec] ss:$16 sps:$4 sm:$0xff]   ;;  %v2385_v33 = vld [vmem:[%s2914_s5 + $0xe0] ss:$16 sps:$4 sm:$0xff]  }
  0x69   : > { %v2386_v34 = vld [vmem:[%s2914_s5 + $0xe8] ss:$16 sps:$4 sm:$0xff]   ;;  %v2387_v35 = vld [vmem:[%s3241_s1] sm:$0xff]   ;;  %v640_v55 = vand.u32 127, %v639_v51 }
  0x6a   : > { %558 = vmatpush1.bf16.msra.mxu0 %v2355_v13  ;;  %601 = vmatpush1.bf16.msra.mxu1 %v2356_v14  ;;  %v650_v50 = vld [vmem:[%s3240_s0] sm:$0xff]  ;;  %v2989_v56 = vld [vmem:[#allocation2 + $0x8] sm:$0xff] }
  0x6b   : > { %559 = vmatprep.subr.bf16.mxu0 %v2357_v15  ;;  %602 = vmatprep.subr.bf16.mxu1 %v2359_v16  ;;  %v2984_v52 = vld [vmem:[#allocation2] sm:$0xff]  ;;  %v641_v60 = vadd.s32 128, %v640_v55  ;;  %v642_v61 = vadd.s32 256, %v640_v55  ;;  %v643_v0 = vadd.s32 384, %v640_v55  ;;  %v651_v1 = vld [vmem:[%s3240_s0 + $0x8] sm:$0xff]  ;;  %v646_v2 = vadd.s32 %v645_v62, %v640_v55 }
  0x6d   : > { %v647_v3 = vadd.s32 %v645_v62, %v641_v60  ;;  %v648_v4 = vadd.s32 %v645_v62, %v642_v61  ;;  %v649_v5 = vadd.s32 %v645_v62, %v643_v0  ;;  %v666_v60 = vld [vmem:[#allocation4] sm:$0xff] }
  0x6e   : > { %560 = vmatpush1.bf16.msra.mxu0 %v2361_v17  ;;  %603 = vmatpush1.bf16.msra.mxu1 %v2362_v18 }
  0x6f   : > { %561 = vmatprep.subr.bf16.mxu0 %v2363_v19  ;;  %604 = vmatprep.subr.bf16.mxu1 %v2365_v20 }
  0x72   : > { %562 = vmatpush1.bf16.msra.mxu0 %v2367_v21  ;;  %605 = vmatpush1.bf16.msra.mxu1 %v2368_v22 }
  0x73   : > { %563 = vmatprep.subr.bf16.mxu0 %v2369_v23  ;;  %606 = vmatprep.subr.bf16.mxu1 %v2371_v24 }
  0x76   : > { %564 = vmatpush1.bf16.msra.mxu0 %v2373_v25  ;;  %607 = vmatpush1.bf16.msra.mxu1 %v2374_v26 }
  0x77   : > { %565 = vmatprep.subr.bf16.mxu0 %v2375_v27  ;;  %608 = vmatprep.subr.bf16.mxu1 %v2377_v28 }
  0x7a   : > { %566 = vmatpush1.bf16.msra.mxu0 %v2379_v29  ;;  %609 = vmatpush1.bf16.msra.mxu1 %v2380_v30 }
  0x7b   : > { %567 = vmatprep.subr.bf16.mxu0 %v2381_v31  ;;  %610 = vmatprep.subr.bf16.mxu1 %v2383_v32 }
  0x7e   : > { %568 = vmatpush1.bf16.msra.mxu0 %v2385_v33  ;;  %611 = vmatpush1.bf16.msra.mxu1 %v2386_v34 }
  0x81   : > { %586 = vmatmul.mubr.bf16.vlgmr.msra.gmra.mrb[0].mxu0 %v2387_v35  ;;  %629 = vmatmul.mubr.bf16.vlgmr.msra.gmra.mrb[0].mxu1 %v2387_v35 }
 0x154   : > { %v587_v36 = vpop.f32.mrb[0].mxu0  ;;  %v2966_v37 = vpop.f32.mrb[0].mxu1 }
 0x155   : > { %v589_v38 = vpop.f32.mrb[1].mxu0  ;;  %v632_v39 = vpop.f32.mrb[1].mxu1  ;;  %v693_v40 = vmax.f32 %v587_v36, %v2966_v37 }
 0x156   : > { %v2969_v41 = vpop.f32.mrb[2].mxu0  ;;  %v2971_v42 = vpop.f32.mrb[2].mxu1  ;;  %v694_v43 = vmax.f32 %v589_v38, %v632_v39 }
 0x157   : > { %v2973_v44 = vpop.f32.mrb[3].mxu0  ;;  %v2975_v45 = vpop.f32.mrb[3].mxu1  ;;  %v698_v46 = vmax.f32 %v2969_v41, %v2971_v42 }
 0x158   : > { %v699_v47 = vmax.f32 %v2973_v44, %v2975_v45  ;;  %v695_v48 = vmax.f32 %v693_v40, %v694_v43 }
 0x15a   : > { %696 = vmax.xlane.f32.xlu0 %v695_v48  ;;  %v700_v49 = vmax.f32 %v698_v46, %v699_v47 }
 0x15e   : > { %701 = vmax.xlane.f32.xlu0 %v700_v49 }
 0x174   : > { %653 = vperm.xlu0 %2338, %v650_v50  }
 0x1e7   : > { %v697_v53 = vpop.xlane.xlu0 %696 }
 0x1e8   : > { %v2987_v54 = vmax.f32 %v2984_v52, %v697_v53 }
 0x1ea   : > { %v705_v57 = vsub.f32 %v2984_v52, %v2987_v54  ;;  %763 = vst.msk [vmem:[#allocation2] sm:$0xff] %vm688_vm1, %v2987_v54  ;;  %717 = vperm.xlu1 %2337, %v2987_v54  }
 0x1eb   : > { %v702_v58 = vpop.xlane.xlu0 %701 }
 0x1ec   : > { %v2998_v59 = vmax.f32 %v2989_v56, %v702_v58  ;;  %v707_v62 = vmul.f32 1.442695, %v705_v57 }
 0x1ee   : > { %v706_v63 = vsub.f32 %v2989_v56, %v2998_v59  ;;  %764 = vst.msk [vmem:[#allocation2 + $0x8] sm:$0xff] %vm688_vm1, %v2998_v59  ;;  %722 = vperm.xlu1 %2337, %v2998_v59  }
 0x1f0   : > { %v709_v0 = vmul.f32 1.442695, %v706_v63 }
 0x1f2   : > { %656 = vperm.xlu1 %2337, %v651_v1   ;;  %v667_v1 = vld [vmem:[#allocation4 + $0x8] sm:$0xff] }
 0x1f3   : > { %v654_v6 = vpop.permute.xlu0 %653 }
 0x1f4   : > { %vm658_vm2 = vcmp.eq.s32.totalorder %v646_v2, %v654_v6  ;;  %vm659_vm3 = vcmp.eq.s32.totalorder %v647_v3, %v654_v6  ;;  %vm660_vm4 = vcmp.eq.s32.totalorder %v648_v4, %v654_v6  ;;  %vm661_vm5 = vcmp.eq.s32.totalorder %v649_v5, %v654_v6 }
 0x1f5   : > { %v668_v7 = vsel %vm658_vm2, %v587_v36, 0.0  ;;  %v669_v8 = vsel %vm659_vm3, %v589_v38, 0.0  ;;  %v670_v10 = vsel %vm660_vm4, %v2966_v37, 0.0  ;;  %v671_v12 = vsel %vm661_vm5, %v632_v39, 0.0 }
 0x1f6   : > { %v676_v9 = vadd.f32 %v669_v8, %v668_v7 }
 0x1f8   : > { %v677_v11 = vadd.f32 %v676_v9, %v670_v10  ;;  %v712_v9 = vld [vmem:[#allocation3 + $0x8] sm:$0xff] }
 0x1fa   : > { %v678_v13 = vadd.f32 %v677_v11, %v671_v12 }
 0x216   : > { %679 = vadd.xlane.f32.xlu1 %v678_v13 }
 0x269   : > { %v718_v14 = vpop.permute.xlu1 %717 }
 0x26a   : > { %v725_v15 = vsub.f32 %v587_v36, %v718_v14  ;;  %v726_v16 = vsub.f32 %v589_v38, %v718_v14  ;;  %v727_v17 = vsub.f32 %v2966_v37, %v718_v14  ;;  %v728_v18 = vsub.f32 %v632_v39, %v718_v14 }
 0x26c   : > { %v733_v19 = vmul.f32 1.442695, %v725_v15  ;;  %v735_v20 = vmul.f32 1.442695, %v726_v16  ;;  %v737_v21 = vmul.f32 1.442695, %v727_v17 }
 0x26d   : > { %v739_v22 = vmul.f32 1.442695, %v728_v18  ;;  %v723_v23 = vpop.permute.xlu1 %722 }
 0x26e   : > { %2388 = vpow2.f32 %v733_v19  ;;  %v729_v24 = vsub.f32 %v2969_v41, %v723_v23  ;;  %v730_v25 = vsub.f32 %v2973_v44, %v723_v23  ;;  %v731_v26 = vsub.f32 %v2971_v42, %v723_v23 }
 0x26f   : > { %2390 = vpow2.f32 %v735_v20  ;;  %v732_v27 = vsub.f32 %v2975_v45, %v723_v23 }
 0x270   : > { %2392 = vpow2.f32 %v737_v21  ;;  %v741_v28 = vmul.f32 1.442695, %v729_v24  ;;  %v743_v29 = vmul.f32 1.442695, %v730_v25  ;;  %v745_v30 = vmul.f32 1.442695, %v731_v26 }
 0x271   : > { %2394 = vpow2.f32 %v739_v22  ;;  %v657_v31 = vpop.permute.xlu1 %656  ;;  %v747_v32 = vmul.f32 1.442695, %v732_v27 }
 0x272   : > { %2396 = vpow2.f32 %v741_v28  ;;  %vm662_vm6 = vcmp.eq.s32.totalorder %v646_v2, %v657_v31  ;;  %vm663_vm7 = vcmp.eq.s32.totalorder %v647_v3, %v657_v31  ;;  %vm664_vm8 = vcmp.eq.s32.totalorder %v648_v4, %v657_v31 }
 0x273   : > { %2398 = vpow2.f32 %v743_v29  ;;  %v672_v33 = vsel %vm662_vm6, %v2969_v41, 0.0  ;;  %v673_v34 = vsel %vm663_vm7, %v2973_v44, 0.0  ;;  %vm665_vm9 = vcmp.eq.s32.totalorder %v649_v5, %v657_v31  ;;  %v711_v5 = vld [vmem:[#allocation3] sm:$0xff] }
 0x274   : > { %v681_v35 = vadd.f32 %v673_v34, %v672_v33  ;;  %2400 = vpow2.f32 %v745_v30  ;;  %v674_v36 = vsel %vm664_vm8, %v2971_v42, 0.0  ;;  %v675_v38 = vsel %vm665_vm9, %v2975_v45, 0.0 }
 0x275   : > { %2402 = vpow2.f32 %v747_v32 }
 0x276   : > { %v682_v37 = vadd.f32 %v681_v35, %v674_v36  ;;  %2404 = vpow2.f32 %v707_v62 }
 0x277   : > { %2406 = vpow2.f32 %v709_v0 }
 0x278   : > { %v2389_v39 = vpop.eup %2388  ;;  %v683_v40 = vadd.f32 %v682_v37, %v675_v38 }
 0x279   : > { %v2391_v43 = vpop.eup %2390 }
 0x27a   : > { %v2393_v46 = vpop.eup %2392  ;;  %684 = vadd.xlane.f32.xlu1 %v683_v40  ;;  %v749_v47 = vadd.f32 %v2391_v43, %v2389_v39 }
 0x27b   : > { %v2395_v48 = vpop.eup %2394 }
 0x27c   : > { %v2397_v49 = vpop.eup %2396  ;;  %v750_v41 = vadd.f32 %v2393_v46, %v749_v47 }
 0x27d   : > { %v2399_v50 = vpop.eup %2398 }
 0x27e   : > { %v751_v44 = vadd.f32 %v2395_v48, %v750_v41  ;;  %v754_v51 = vadd.f32 %v2399_v50, %v2397_v49  ;;  %v2401_v53 = vpop.eup %2400 }
 0x27f   : > { %v2403_v42 = vpop.eup %2402 }
 0x280   : > { %752 = vadd.xlane.f32.xlu0 %v751_v44  ;;  %v755_v55 = vadd.f32 %v2401_v53, %v754_v51  ;;  %v2405_v4 = vpop.eup %2404 }
 0x281   : > { %v713_v6 = vmul.f32 %v2405_v4, %v711_v5  ;;  %v2407_v7 = vpop.eup %2406 }
 0x282   : > { %v756_v58 = vadd.f32 %v2403_v42, %v755_v55  ;;  %v714_v52 = vmul.f32 %v2407_v7, %v712_v9 }
 0x284   : > { %757 = vadd.xlane.f32.xlu1 %v756_v58 }
 0x2a3   : > { %v680_v45 = vpop.xlane.xlu1 %679 }
 0x2a4   : > { %v686_v61 = vadd.f32 %v680_v45, %v666_v60 }
 0x2a6   : > { %689 = vst.msk [vmem:[#allocation4] sm:$0xff] %vm688_vm1, %v686_v61 }
 0x307   : > { %v685_v2 = vpop.xlane.xlu1 %684 }
 0x308   : > { %v687_v3 = vadd.f32 %v685_v2, %v667_v1 }
 0x30a   : > { %690 = vst.msk [vmem:[#allocation4 + $0x8] sm:$0xff] %vm688_vm1, %v687_v3 }
 0x30d   : > { %v753_v8 = vpop.xlane.xlu0 %752 }
 0x30e   : > { %v759_v10 = vadd.f32 %v753_v8, %v713_v6 }
 0x310   : > { %761 = vst.msk [vmem:[#allocation3] sm:$0xff] %vm688_vm1, %v759_v10 }
 0x311   : > { %v758_v54 = vpop.xlane.xlu1 %757 }
 0x312   : > { %v760_v57 = vadd.f32 %v758_v54, %v714_v52 }
 0x314   : > { %762 = vst.msk [vmem:[#allocation3 + $0x8] sm:$0xff] %vm688_vm1, %v760_v57 }
 0x315 PF: > { %767 = sbr.rel (%p2100_p3) target bundleno = 1484 (0x5cc), region = 56  ;;  %v2410_v56 = vld [vmem:[%s2914_s5 + $0x4] ss:$16 sps:$4 sm:$0xff] (!%p2100_p3)   ;;  %v2412_v59 = vld [vmem:[%s2914_s5] ss:$16 sps:$4 sm:$0xff] (!%p2100_p3)   ;;  %v2762_v63 = vmov (!%p2100_p3), 0   ;;  %v1054_v26 = vlaneseq (!%p2100_p3) }
 0x316   : > { %1000 = vmatprep.mubr.bf16.mxu0 (!%p2100_p3), %v2762_v63  ;;  %2409 = vset.pattern.permute.xlu0 (!%p2100_p3), %v2762_v63  ;;  %v2413_v11 = vld [vmem:[%s2914_s5 + $0x24] ss:$16 sps:$4 sm:$0xff] (!%p2100_p3)   ;;  %v2415_v12 = vld [vmem:[%s2914_s5 + $0x20] ss:$16 sps:$4 sm:$0xff] (!%p2100_p3)   ;;  %v2435_v46 = vld [vmem:[%s2914_s5 + $0xc] ss:$16 sps:$4 sm:$0xff] (!%p2100_p3)  }
 0x317   : > { %968 = vmatprep.subr.bf16.mxu0 (!%p2100_p3), %v2410_v56  ;;  %2408 = vset.pattern.permute.xlu1 (!%p2100_p3), %v2762_v63  ;;  %v2416_v13 = vld [vmem:[%s2914_s5 + $0x44] ss:$16 sps:$4 sm:$0xff] (!%p2100_p3)   ;;  %v2418_v14 = vld [vmem:[%s2914_s5 + $0x40] ss:$16 sps:$4 sm:$0xff] (!%p2100_p3)   ;;  %v3049_v27 = vand.u32 (!%p2100_p3), 127, %v1054_v26  ;;  %vm1115_vm11 = vcmask (!%p2100_p3), 7168  }
 0x318   : > { %969 = vmatpush1.bf16.msra.mxu0 (!%p2100_p3), %v2412_v59  ;;  %1043 = vmatprep.mubr.bf16.mxu1 (!%p2100_p3), %v2762_v63  ;;  %v2419_v15 = vld [vmem:[%s2914_s5 + $0x64] ss:$16 sps:$4 sm:$0xff] (!%p2100_p3)   ;;  %v2421_v16 = vld [vmem:[%s2914_s5 + $0x60] ss:$16 sps:$4 sm:$0xff] (!%p2100_p3)   ;;  %v2437_v47 = vld [vmem:[%s2914_s5 + $0x8] ss:$16 sps:$4 sm:$0xff] (!%p2100_p3)  }
 0x319   : > { %970 = vmatprep.subr.bf16.mxu0 (!%p2100_p3), %v2413_v11  ;;  %v2422_v17 = vld [vmem:[%s2914_s5 + $0x84] ss:$16 sps:$4 sm:$0xff] (!%p2100_p3)   ;;  %v2424_v18 = vld [vmem:[%s2914_s5 + $0x80] ss:$16 sps:$4 sm:$0xff] (!%p2100_p3)   ;;  %v3052_v28 = vadd.s32 (!%p2100_p3), 128, %v3049_v27  ;;  %1011 = vmatprep.subr.bf16.mxu1 (!%p2100_p3), %v2435_v46  ;;  %v3091_v3 = vld [vmem:[#allocation2 + $0x8] sm:$0xff] (!%p2100_p3) }
 0x31a   : > { %v2425_v19 = vld [vmem:[%s2914_s5 + $0xa4] ss:$16 sps:$4 sm:$0xff] (!%p2100_p3)   ;;  %v2427_v20 = vld [vmem:[%s2914_s5 + $0xa0] ss:$16 sps:$4 sm:$0xff] (!%p2100_p3)   ;;  %v2438_v48 = vld [vmem:[%s2914_s5 + $0x2c] ss:$16 sps:$4 sm:$0xff] (!%p2100_p3)   ;;  %1012 = vmatpush1.bf16.msra.mxu1 (!%p2100_p3), %v2437_v47 }
 0x31b   : > { %v2428_v21 = vld [vmem:[%s2914_s5 + $0xc4] ss:$16 sps:$4 sm:$0xff] (!%p2100_p3)   ;;  %v2430_v22 = vld [vmem:[%s2914_s5 + $0xc0] ss:$16 sps:$4 sm:$0xff] (!%p2100_p3)   ;;  %vm1060_vm10 = vcmp.lt.s32.totalorder (!%p2100_p3), %v3052_v28, 250  ;;  %1013 = vmatprep.subr.bf16.mxu1 (!%p2100_p3), %v2438_v48  ;;  %v1078_v8 = vld [vmem:[%s3240_s0 + $0x8] sm:$0xff] (!%p2100_p3) }
 0x31c   : > { %971 = vmatpush1.bf16.msra.mxu0 %v2415_v12  ;;  %v2431_v23 = vld [vmem:[%s2914_s5 + $0xe4] ss:$16 sps:$4 sm:$0xff]   ;;  %v2433_v24 = vld [vmem:[%s2914_s5 + $0xe0] ss:$16 sps:$4 sm:$0xff]   ;;  %v2440_v49 = vld [vmem:[%s2914_s5 + $0x28] ss:$16 sps:$4 sm:$0xff]  }
 0x31d   : > { %972 = vmatprep.subr.bf16.mxu0 %v2416_v13  ;;  %v2434_v25 = vld [vmem:[%s3241_s1] sm:$0xff]   ;;  %v2441_v41 = vld [vmem:[%s2914_s5 + $0x4c] ss:$16 sps:$4 sm:$0xff]   ;;  %v2443_v50 = vld [vmem:[%s2914_s5 + $0x48] ss:$16 sps:$4 sm:$0xff]   ;;  %s2170_s28 = sshll.u32 %s2745_s19, 9 }
 0x31e   : > { %v1077_v43 = vld [vmem:[%s3240_s0] sm:$0xff]  ;;  %1014 = vmatpush1.bf16.msra.mxu1 %v2440_v49  ;;  %v2444_v44 = vld [vmem:[%s2914_s5 + $0x6c] ss:$16 sps:$4 sm:$0xff]   ;;  %v2446_v51 = vld [vmem:[%s2914_s5 + $0x68] ss:$16 sps:$4 sm:$0xff]   ;;  %v1072_v9 = vstv %s2170_s28  ;;  %v1057_v54 = vadd.s32 256, %v3049_v27 }
 0x31f   : > { %1015 = vmatprep.subr.bf16.mxu1 %v2441_v41  ;;  %v2447_v53 = vld [vmem:[%s2914_s5 + $0x8c] ss:$16 sps:$4 sm:$0xff]   ;;  %v2449_v55 = vld [vmem:[%s2914_s5 + $0x88] ss:$16 sps:$4 sm:$0xff]   ;;  %v3086_v0 = vld [vmem:[#allocation2] sm:$0xff]  ;;  %v1074_v10 = vadd.s32 %v1072_v9, %v3052_v28  ;;  %v1073_v52 = vadd.s32 %v1072_v9, %v3049_v27  ;;  %v1058_v56 = vadd.s32 384, %v3049_v27 }
 0x320   : > { %973 = vmatpush1.bf16.msra.mxu0 %v2418_v14  ;;  %v2450_v42 = vld [vmem:[%s2914_s5 + $0xac] ss:$16 sps:$4 sm:$0xff]   ;;  %v2452_v58 = vld [vmem:[%s2914_s5 + $0xa8] ss:$16 sps:$4 sm:$0xff]   ;;  %v1075_v59 = vadd.s32 %v1072_v9, %v1057_v54  ;;  %v2763_v14 = vmov 0.0  }
 0x321   : > { %974 = vmatprep.subr.bf16.mxu0 %v2419_v15  ;;  %v2453_v60 = vld [vmem:[%s2914_s5 + $0xcc] ss:$16 sps:$4 sm:$0xff]   ;;  %v2455_v45 = vld [vmem:[%s2914_s5 + $0xc8] ss:$16 sps:$4 sm:$0xff]   ;;  %v1076_v12 = vadd.s32 %v1072_v9, %v1058_v56  ;;  %v1138_v56 = vld [vmem:[#allocation3] sm:$0xff] }
 0x322   : > { %1016 = vmatpush1.bf16.msra.mxu1 %v2443_v50  ;;  %v2456_v61 = vld [vmem:[%s2914_s5 + $0xec] ss:$16 sps:$4 sm:$0xff]   ;;  %v2458_v62 = vld [vmem:[%s2914_s5 + $0xe8] ss:$16 sps:$4 sm:$0xff]  }
 0x323   : > { %1017 = vmatprep.subr.bf16.mxu1 %v2444_v44 }
 0x324   : > { %975 = vmatpush1.bf16.msra.mxu0 %v2421_v16 }
 0x325   : > { %976 = vmatprep.subr.bf16.mxu0 %v2422_v17 }
 0x326   : > { %1018 = vmatpush1.bf16.msra.mxu1 %v2446_v51 }
 0x327   : > { %1019 = vmatprep.subr.bf16.mxu1 %v2447_v53 }
 0x328   : > { %977 = vmatpush1.bf16.msra.mxu0 %v2424_v18 }
 0x329   : > { %978 = vmatprep.subr.bf16.mxu0 %v2425_v19 }
 0x32a   : > { %1020 = vmatpush1.bf16.msra.mxu1 %v2449_v55 }
 0x32b   : > { %1021 = vmatprep.subr.bf16.mxu1 %v2450_v42 }
 0x32c   : > { %979 = vmatpush1.bf16.msra.mxu0 %v2427_v20 }
 0x32d   : > { %980 = vmatprep.subr.bf16.mxu0 %v2428_v21 }
 0x32e   : > { %1022 = vmatpush1.bf16.msra.mxu1 %v2452_v58 }
 0x32f   : > { %1023 = vmatprep.subr.bf16.mxu1 %v2453_v60 }
 0x330   : > { %981 = vmatpush1.bf16.msra.mxu0 %v2430_v22 }
 0x331   : > { %982 = vmatprep.subr.bf16.mxu0 %v2431_v23 }
 0x332   : > { %1024 = vmatpush1.bf16.msra.mxu1 %v2455_v45 }
 0x333   : > { %1025 = vmatprep.subr.bf16.mxu1 %v2456_v61 }
 0x334   : > { %983 = vmatpush1.bf16.msra.mxu0 %v2433_v24 }
 0x336   : > { %1026 = vmatpush1.bf16.msra.mxu1 %v2458_v62  ;;  %v1093_v62 = vld [vmem:[#allocation4] sm:$0xff] }
 0x337   : > { %1001 = vmatmul.mubr.bf16.vlgmr.msra.gmra.mrb[0].mxu0 %v2434_v25 }
 0x339   : > { %1044 = vmatmul.mubr.bf16.vlgmr.msra.gmra.mrb[0].mxu1 %v2434_v25 }
 0x40a   : > { %v3055_v29 = vpop.f32.mrb[0].mxu0 }
 0x40b   : > { %v1004_v30 = vpop.f32.mrb[1].mxu0  ;;  %v1120_v34 = vmax.f32 %v3055_v29, -1e+30 }
 0x40c   : > { %v3057_v31 = vsel %vm1060_vm10, %v1004_v30, -1e+30  ;;  %v3059_v32 = vpop.f32.mrb[2].mxu0  ;;  %v1045_v58 = vpop.f32.mrb[0].mxu1 }
 0x40d   : > { %v1008_v33 = vpop.f32.mrb[3].mxu0  ;;  %v1121_v35 = vmax.f32 %v3057_v31, -1e+30  ;;  %v1125_v39 = vmax.f32 %v3059_v32, -1e+30  ;;  %v1047_v60 = vpop.f32.mrb[1].mxu1 }
 0x40e   : > { %v3063_v36 = vsel %vm1060_vm10, %v1008_v33, -1e+30  ;;  %v1049_v45 = vpop.f32.mrb[2].mxu1 }
 0x40f   : > { %v1126_v37 = vmax.f32 %v3063_v36, -1e+30  ;;  %v1122_v38 = vmax.f32 %v1120_v34, %v1121_v35  ;;  %v1051_v61 = vpop.f32.mrb[3].mxu1 }
 0x411   : > { %1123 = vmax.xlane.f32.xlu0 %v1122_v38  ;;  %v1127_v40 = vmax.f32 %v1125_v39, %v1126_v37 }
 0x415   : > { %1128 = vmax.xlane.f32.xlu0 %v1127_v40 }
 0x42b   : > { %1080 = vperm.xlu0 %2409, %v1077_v43  }
 0x49e   : > { %v1124_v1 = vpop.xlane.xlu0 %1123 }
 0x49f   : > { %v3089_v2 = vmax.f32 %v3086_v0, %v1124_v1 }
 0x4a1   : > { %v1132_v4 = vsub.f32 %v3086_v0, %v3089_v2  ;;  %1190 = vst.msk [vmem:[#allocation2] sm:$0xff] %vm1115_vm11, %v3089_v2  ;;  %1144 = vperm.xlu1 %2408, %v3089_v2  }
 0x4a2   : > { %v1129_v5 = vpop.xlane.xlu0 %1128 }
 0x4a3   : > { %v3099_v6 = vmax.f32 %v3091_v3, %v1129_v5 }
 0x4a5   : > { %v1133_v7 = vsub.f32 %v3091_v3, %v3099_v6  ;;  %1191 = vst.msk [vmem:[#allocation2 + $0x8] sm:$0xff] %vm1115_vm11, %v3099_v6  ;;  %1149 = vperm.xlu1 %2408, %v3099_v6  }
 0x4a7   : > { %v1136_v9 = vmul.f32 1.442695, %v1133_v7 }
 0x4a9   : > { %1083 = vperm.xlu1 %2408, %v1078_v8   ;;  %v1134_v8 = vmul.f32 1.442695, %v1132_v4 }
 0x4aa   : > { %v1081_v57 = vpop.permute.xlu0 %1080 }
 0x4ab   : > { %vm1085_vm12 = vcmp.eq.s32.totalorder %v1073_v52, %v1081_v57  ;;  %vm1086_vm13 = vcmp.eq.s32.totalorder %v1074_v10, %v1081_v57  ;;  %vm1087_vm14 = vcmp.eq.s32.totalorder %v1075_v59, %v1081_v57  ;;  %vm1088_vm15 = vcmp.eq.s32.totalorder %v1076_v12, %v1081_v57 }
 0x4ac   : > { %v1095_v63 = vsel %vm1085_vm12, %v3055_v29, 0.0  ;;  %v1096_v11 = vsel %vm1086_vm13, %v3057_v31, 0.0  ;;  %v1097_v15 = vsel %vm1087_vm14, -1e+30, %v2763_v14  ;;  %v1098_v17 = vsel %vm1088_vm15, -1e+30, %v2763_v14 }
 0x4ad   : > { %v1103_v13 = vadd.f32 %v1096_v11, %v1095_v63 }
 0x4af   : > { %v1104_v16 = vadd.f32 %v1103_v13, %v1097_v15 }
 0x4b1   : > { %v1105_v18 = vadd.f32 %v1104_v16, %v1098_v17 }
 0x4cd   : > { %1106 = vadd.xlane.f32.xlu1 %v1105_v18 }
 0x520   : > { %v1145_v19 = vpop.permute.xlu1 %1144 }
 0x521   : > { %v1152_v20 = vsub.f32 %v3055_v29, %v1145_v19  ;;  %v1153_v21 = vsub.f32 %v3057_v31, %v1145_v19  ;;  %v1154_v22 = vsub.f32 -1e+30, %v1145_v19 }
 0x523   : > { %v1160_v23 = vmul.f32 1.442695, %v1152_v20  ;;  %v1162_v24 = vmul.f32 1.442695, %v1153_v21  ;;  %v1164_v25 = vmul.f32 1.442695, %v1154_v22 }
 0x524   : > { %v1150_v26 = vpop.permute.xlu1 %1149 }
 0x525   : > { %2459 = vpow2.f32 %v1160_v23  ;;  %v1156_v27 = vsub.f32 %v3059_v32, %v1150_v26  ;;  %v1157_v28 = vsub.f32 %v3063_v36, %v1150_v26  ;;  %v1158_v30 = vsub.f32 -1e+30, %v1150_v26 }
 0x526   : > { %2461 = vpow2.f32 %v1162_v24 }
 0x527   : > { %v1168_v33 = vmul.f32 1.442695, %v1156_v27  ;;  %v1170_v34 = vmul.f32 1.442695, %v1157_v28  ;;  %2463 = vpow2.f32 %v1164_v25  ;;  %v1172_v35 = vmul.f32 1.442695, %v1158_v30 }
 0x528   : > { %v1084_v37 = vpop.permute.xlu1 %1083 }
 0x529   : > { %2465 = vpow2.f32 %v1168_v33  ;;  %vm1089_vm0 = vcmp.eq.s32.totalorder %v1073_v52, %v1084_v37  ;;  %vm1090_vm1 = vcmp.eq.s32.totalorder %v1074_v10, %v1084_v37  ;;  %vm1091_vm2 = vcmp.eq.s32.totalorder %v1075_v59, %v1084_v37  ;;  %v1094_v10 = vld [vmem:[#allocation4 + $0x8] sm:$0xff] }
 0x52a   : > { %2467 = vpow2.f32 %v1170_v34  ;;  %v1099_v29 = vsel %vm1089_vm0, %v3059_v32, 0.0  ;;  %v1100_v31 = vsel %vm1090_vm1, %v3063_v36, 0.0  ;;  %vm1092_vm3 = vcmp.eq.s32.totalorder %v1076_v12, %v1084_v37  ;;  %v1139_v12 = vld [vmem:[#allocation3 + $0x8] sm:$0xff] }
 0x52b   : > { %v1108_v38 = vadd.f32 %v1100_v31, %v1099_v29  ;;  %2469 = vpow2.f32 %v1172_v35  ;;  %v1101_v39 = vsel %vm1091_vm2, -1e+30, %v2763_v14  ;;  %v1102_v43 = vsel %vm1092_vm3, -1e+30, %v2763_v14 }
 0x52c   : > { %2471 = vpow2.f32 %v1134_v8 }
 0x52d   : > { %v1109_v40 = vadd.f32 %v1108_v38, %v1101_v39  ;;  %2473 = vpow2.f32 %v1136_v9 }
 0x52f   : > { %v2460_v46 = vpop.eup %2459  ;;  %v1110_v47 = vadd.f32 %v1109_v40, %v1102_v43 }
 0x530   : > { %v2462_v48 = vpop.eup %2461 }
 0x531   : > { %1111 = vadd.xlane.f32.xlu1 %v1110_v47  ;;  %v1176_v49 = vadd.f32 %v2462_v48, %v2460_v46  ;;  %v2464_v41 = vpop.eup %2463 }
 0x533   : > { %v2466_v50 = vpop.eup %2465  ;;  %v1177_v44 = vadd.f32 %v2464_v41, %v1176_v49 }
 0x534   : > { %v2468_v51 = vpop.eup %2467 }
 0x535   : > { %v1178_v53 = vadd.f32 %v2464_v41, %v1177_v44  ;;  %v1181_v55 = vadd.f32 %v2468_v51, %v2466_v50  ;;  %v2470_v32 = vpop.eup %2469 }
 0x536   : > { %v2472_v57 = vpop.eup %2471 }
 0x537   : > { %1179 = vadd.xlane.f32.xlu0 %v1178_v53  ;;  %v1182_v36 = vadd.f32 %v2470_v32, %v1181_v55  ;;  %v1140_v59 = vmul.f32 %v2472_v57, %v1138_v56  ;;  %v2474_v63 = vpop.eup %2473 }
 0x538   : > { %v1141_v0 = vmul.f32 %v2474_v63, %v1139_v12 }
 0x539   : > { %v1183_v42 = vadd.f32 %v2470_v32, %v1182_v36 }
 0x53b   : > { %1184 = vadd.xlane.f32.xlu1 %v1183_v42 }
 0x55a   : > { %v1107_v1 = vpop.xlane.xlu1 %1106 }
 0x55b   : > { %v1113_v5 = vadd.f32 %v1107_v1, %v1093_v62 }
 0x55d   : > { %1116 = vst.msk [vmem:[#allocation4] sm:$0xff] %vm1115_vm11, %v1113_v5 }
 0x5be   : > { %v1112_v52 = vpop.xlane.xlu1 %1111 }
 0x5bf   : > { %v1114_v54 = vadd.f32 %v1112_v52, %v1094_v10 }
 0x5c1   : > { %1117 = vst.msk [vmem:[#allocation4 + $0x8] sm:$0xff] %vm1115_vm11, %v1114_v54 }
 0x5c4   : > { %v1180_v11 = vpop.xlane.xlu0 %1179 }
 0x5c5   : > { %v1186_v13 = vadd.f32 %v1180_v11, %v1140_v59 }
 0x5c7   : > { %1188 = vst.msk [vmem:[#allocation3] sm:$0xff] %vm1115_vm11, %v1186_v13 }
 0x5c8   : > { %v1185_v2 = vpop.xlane.xlu1 %1184 }
 0x5c9   : > { %v1187_v4 = vadd.f32 %v1185_v2, %v1141_v0 }
 0x5cb   : > { %1189 = vst.msk [vmem:[#allocation3 + $0x8] sm:$0xff] %vm1115_vm11, %v1187_v4 }
 0x5cc PF: > { %p1192_p4 = scmp.ge.s32.totalorder %s2745_s19, 1  ;;  %p1193_p7 = scmp.lt.s32.totalorder %s2745_s19, 1 }
 0x5ce   : > { %p1194_p8 = pnand %p1193_p7, %p1192_p4 }
 0x5cf   : > { %v2477_v3 = vld [vmem:[%s2921_s13 + $0x4] ss:$16 sps:$4 sm:$0xff] (!%p1194_p8)   ;;  %v2479_v6 = vld [vmem:[%s2921_s13 + $0xc] ss:$16 sps:$4 sm:$0xff] (!%p1194_p8)   ;;  %v2764_v7 = vmov (!%p1194_p8), 0   ;;  %vm1554_vm4 = vcmask (!%p1194_p8), 7168  }
 0x5d0   : > { %1197 = sbr.rel (%p1194_p8) target bundleno = 2182 (0x886), region = 60  ;;  %1430 = vmatprep.mubr.bf16.mxu0 (!%p1194_p8), %v2764_v7  ;;  %1473 = vmatprep.mubr.bf16.mxu1 (!%p1194_p8), %v2764_v7  ;;  %v2481_v14 = vld [vmem:[%s2921_s13] ss:$16 sps:$4 sm:$0xff] (!%p1194_p8)   ;;  %v2482_v15 = vld [vmem:[%s2921_s13 + $0x8] ss:$16 sps:$4 sm:$0xff] (!%p1194_p8)  }
 0x5d1   : > { %1398 = vmatprep.subr.bf16.mxu0 (!%p1194_p8), %v2477_v3  ;;  %2475 = vset.pattern.permute.xlu1 (!%p1194_p8), %v2764_v7  ;;  %v2483_v16 = vld [vmem:[%s2921_s13 + $0x24] ss:$16 sps:$4 sm:$0xff] (!%p1194_p8)   ;;  %v2485_v17 = vld [vmem:[%s2921_s13 + $0x2c] ss:$16 sps:$4 sm:$0xff] (!%p1194_p8)   ;;  %v2487_v18 = vld [vmem:[%s2921_s13 + $0x20] ss:$16 sps:$4 sm:$0xff] (!%p1194_p8)  }
 0x5d2   : > { %1441 = vmatprep.subr.bf16.mxu1 (!%p1194_p8), %v2479_v6  ;;  %2476 = vset.pattern.permute.xlu0 (!%p1194_p8), %v2764_v7  ;;  %v2488_v19 = vld [vmem:[%s2921_s13 + $0x28] ss:$16 sps:$4 sm:$0xff] (!%p1194_p8)   ;;  %v2489_v20 = vld [vmem:[%s2921_s13 + $0x44] ss:$16 sps:$4 sm:$0xff] (!%p1194_p8)   ;;  %v2491_v21 = vld [vmem:[%s2921_s13 + $0x4c] ss:$16 sps:$4 sm:$0xff] (!%p1194_p8)  }
 0x5d3   : > { %1399 = vmatpush1.bf16.msra.mxu0 (!%p1194_p8), %v2481_v14  ;;  %1442 = vmatpush1.bf16.msra.mxu1 (!%p1194_p8), %v2482_v15  ;;  %v2493_v22 = vld [vmem:[%s2921_s13 + $0x40] ss:$16 sps:$4 sm:$0xff] (!%p1194_p8)   ;;  %v2494_v23 = vld [vmem:[%s2921_s13 + $0x48] ss:$16 sps:$4 sm:$0xff] (!%p1194_p8)   ;;  %v2495_v24 = vld [vmem:[%s2921_s13 + $0x64] ss:$16 sps:$4 sm:$0xff] (!%p1194_p8)  }
 0x5d4   : > { %1400 = vmatprep.subr.bf16.mxu0 (!%p1194_p8), %v2483_v16  ;;  %1443 = vmatprep.subr.bf16.mxu1 (!%p1194_p8), %v2485_v17  ;;  %v2497_v25 = vld [vmem:[%s2921_s13 + $0x6c] ss:$16 sps:$4 sm:$0xff] (!%p1194_p8)   ;;  %v2499_v26 = vld [vmem:[%s2921_s13 + $0x60] ss:$16 sps:$4 sm:$0xff] (!%p1194_p8)   ;;  %v2500_v27 = vld [vmem:[%s2921_s13 + $0x68] ss:$16 sps:$4 sm:$0xff] (!%p1194_p8)  }
 0x5d5   : > { %v2501_v28 = vld [vmem:[%s2921_s13 + $0x84] ss:$16 sps:$4 sm:$0xff] (!%p1194_p8)   ;;  %v2503_v30 = vld [vmem:[%s2921_s13 + $0x8c] ss:$16 sps:$4 sm:$0xff] (!%p1194_p8)   ;;  %v2505_v33 = vld [vmem:[%s2921_s13 + $0x80] ss:$16 sps:$4 sm:$0xff] (!%p1194_p8)  }
 0x5d6   : > { %v2506_v34 = vld [vmem:[%s2921_s13 + $0x88] ss:$16 sps:$4 sm:$0xff] (!%p1194_p8)   ;;  %v2507_v35 = vld [vmem:[%s2921_s13 + $0xa4] ss:$16 sps:$4 sm:$0xff] (!%p1194_p8)   ;;  %v2509_v37 = vld [vmem:[%s2921_s13 + $0xac] ss:$16 sps:$4 sm:$0xff] (!%p1194_p8)  }
 0x5d7   : > { %1401 = vmatpush1.bf16.msra.mxu0 %v2487_v18  ;;  %1444 = vmatpush1.bf16.msra.mxu1 %v2488_v19  ;;  %v2511_v29 = vld [vmem:[%s2921_s13 + $0xa0] ss:$16 sps:$4 sm:$0xff]   ;;  %v2512_v31 = vld [vmem:[%s2921_s13 + $0xa8] ss:$16 sps:$4 sm:$0xff]   ;;  %v2513_v38 = vld [vmem:[%s2921_s13 + $0xc4] ss:$16 sps:$4 sm:$0xff]  }
 0x5d8   : > { %1402 = vmatprep.subr.bf16.mxu0 %v2489_v20  ;;  %1445 = vmatprep.subr.bf16.mxu1 %v2491_v21  ;;  %v2515_v39 = vld [vmem:[%s2921_s13 + $0xcc] ss:$16 sps:$4 sm:$0xff]   ;;  %v2517_v40 = vld [vmem:[%s2921_s13 + $0xc0] ss:$16 sps:$4 sm:$0xff]   ;;  %v2518_v43 = vld [vmem:[%s2921_s13 + $0xc8] ss:$16 sps:$4 sm:$0xff]  }
 0x5d9   : > { %v2519_v46 = vld [vmem:[%s2921_s13 + $0xe4] ss:$16 sps:$4 sm:$0xff]   ;;  %v2521_v47 = vld [vmem:[%s2921_s13 + $0xec] ss:$16 sps:$4 sm:$0xff]   ;;  %v2523_v48 = vld [vmem:[%s2921_s13 + $0xe0] ss:$16 sps:$4 sm:$0xff]  }
 0x5da   : > { %v2524_v49 = vld [vmem:[%s2921_s13 + $0xe8] ss:$16 sps:$4 sm:$0xff]   ;;  %v2525_v41 = vld [vmem:[%s3241_s1] sm:$0xff]  }
 0x5db   : > { %1403 = vmatpush1.bf16.msra.mxu0 %v2493_v22  ;;  %1446 = vmatpush1.bf16.msra.mxu1 %v2494_v23  ;;  %v1484_v5 = vld [vmem:[#allocation2] sm:$0xff]  ;;  %v1485_v10 = vld [vmem:[#allocation2 + $0x8] sm:$0xff] }
 0x5dc   : > { %1404 = vmatprep.subr.bf16.mxu0 %v2495_v24  ;;  %1447 = vmatprep.subr.bf16.mxu1 %v2497_v25 }
 0x5df   : > { %1405 = vmatpush1.bf16.msra.mxu0 %v2499_v26  ;;  %1448 = vmatpush1.bf16.msra.mxu1 %v2500_v27 }
 0x5e0   : > { %1406 = vmatprep.subr.bf16.mxu0 %v2501_v28  ;;  %1449 = vmatprep.subr.bf16.mxu1 %v2503_v30 }
 0x5e3   : > { %1407 = vmatpush1.bf16.msra.mxu0 %v2505_v33  ;;  %1450 = vmatpush1.bf16.msra.mxu1 %v2506_v34 }
 0x5e4   : > { %1408 = vmatprep.subr.bf16.mxu0 %v2507_v35  ;;  %1451 = vmatprep.subr.bf16.mxu1 %v2509_v37 }
 0x5e7   : > { %1409 = vmatpush1.bf16.msra.mxu0 %v2511_v29  ;;  %1452 = vmatpush1.bf16.msra.mxu1 %v2512_v31 }
 0x5e8   : > { %1410 = vmatprep.subr.bf16.mxu0 %v2513_v38  ;;  %1453 = vmatprep.subr.bf16.mxu1 %v2515_v39 }
 0x5eb   : > { %1411 = vmatpush1.bf16.msra.mxu0 %v2517_v40  ;;  %1454 = vmatpush1.bf16.msra.mxu1 %v2518_v43  ;;  %v1504_v40 = vld [vmem:[#allocation3] sm:$0xff] }
 0x5ec   : > { %1412 = vmatprep.subr.bf16.mxu0 %v2519_v46  ;;  %1455 = vmatprep.subr.bf16.mxu1 %v2521_v47 }
 0x5ef   : > { %1413 = vmatpush1.bf16.msra.mxu0 %v2523_v48  ;;  %1456 = vmatpush1.bf16.msra.mxu1 %v2524_v49  ;;  %v1505_v48 = vld [vmem:[#allocation3 + $0x8] sm:$0xff] }
 0x5f2   : > { %1431 = vmatmul.mubr.bf16.vlgmr.msra.gmra.mrb[0].mxu0 %v2525_v41  ;;  %1474 = vmatmul.mubr.bf16.vlgmr.msra.gmra.mrb[0].mxu1 %v2525_v41 }
 0x6c5   : > { %v1432_v50 = vpop.f32.mrb[0].mxu0  ;;  %v1475_v44 = vpop.f32.mrb[0].mxu1 }
 0x6c6   : > { %v1486_v51 = vmax.f32 %v1432_v50, %v1475_v44  ;;  %v1434_v53 = vpop.f32.mrb[1].mxu0  ;;  %v1477_v55 = vpop.f32.mrb[1].mxu1 }
 0x6c7   : > { %v1487_v32 = vmax.f32 %v1434_v53, %v1477_v55  ;;  %v1436_v36 = vpop.f32.mrb[2].mxu0  ;;  %v1479_v42 = vpop.f32.mrb[2].mxu1 }
 0x6c8   : > { %v1491_v58 = vmax.f32 %v1436_v36, %v1479_v42  ;;  %v1438_v60 = vpop.f32.mrb[3].mxu0  ;;  %v1481_v45 = vpop.f32.mrb[3].mxu1 }
 0x6c9   : > { %v1492_v61 = vmax.f32 %v1438_v60, %v1481_v45  ;;  %v1488_v62 = vmax.f32 %v1486_v51, %v1487_v32 }
 0x6cb   : > { %1489 = vmax.xlane.f32.xlu0 %v1488_v62  ;;  %v1493_v1 = vmax.f32 %v1491_v58, %v1492_v61 }
 0x6cf   : > { %1494 = vmax.xlane.f32.xlu0 %v1493_v1 }
 0x758   : > { %v1490_v8 = vpop.xlane.xlu0 %1489 }
 0x759   : > { %v1496_v9 = vmax.f32 %v1484_v5, %v1490_v8 }
 0x75b   : > { %v1498_v52 = vsub.f32 %v1484_v5, %v1496_v9  ;;  %1557 = vst.msk [vmem:[#allocation2] sm:$0xff] %vm1554_vm4, %v1496_v9  ;;  %1510 = vperm.xlu1 %2475, %v1496_v9  }
 0x75c   : > { %v1495_v54 = vpop.xlane.xlu0 %1494 }
 0x75d   : > { %v1497_v57 = vmax.f32 %v1485_v10, %v1495_v54  ;;  %v1500_v31 = vmul.f32 1.442695, %v1498_v52 }
 0x75f   : > { %v1499_v56 = vsub.f32 %v1485_v10, %v1497_v57  ;;  %1558 = vst.msk [vmem:[#allocation2 + $0x8] sm:$0xff] %vm1554_vm4, %v1497_v57  ;;  %1515 = vperm.xlu1 %2475, %v1497_v57  }
 0x761   : > { %v1502_v38 = vmul.f32 1.442695, %v1499_v56 }
 0x7da   : > { %v1511_v59 = vpop.permute.xlu1 %1510 }
 0x7db   : > { %v1518_v63 = vsub.f32 %v1432_v50, %v1511_v59  ;;  %v1519_v11 = vsub.f32 %v1434_v53, %v1511_v59  ;;  %v1520_v12 = vsub.f32 %v1475_v44, %v1511_v59  ;;  %v1521_v13 = vsub.f32 %v1477_v55, %v1511_v59 }
 0x7dd   : > { %v1526_v0 = vmul.f32 1.442695, %v1518_v63  ;;  %v1528_v2 = vmul.f32 1.442695, %v1519_v11  ;;  %v1530_v4 = vmul.f32 1.442695, %v1520_v12 }
 0x7de   : > { %v1532_v3 = vmul.f32 1.442695, %v1521_v13  ;;  %v1516_v6 = vpop.permute.xlu1 %1515 }
 0x7df   : > { %2526 = vpow2.f32 %v1526_v0  ;;  %v1522_v7 = vsub.f32 %v1436_v36, %v1516_v6  ;;  %v1523_v14 = vsub.f32 %v1438_v60, %v1516_v6  ;;  %v1524_v15 = vsub.f32 %v1479_v42, %v1516_v6 }
 0x7e0   : > { %2528 = vpow2.f32 %v1528_v2  ;;  %v1525_v16 = vsub.f32 %v1481_v45, %v1516_v6 }
 0x7e1   : > { %2530 = vpow2.f32 %v1530_v4  ;;  %v1534_v17 = vmul.f32 1.442695, %v1522_v7  ;;  %v1536_v18 = vmul.f32 1.442695, %v1523_v14  ;;  %v1538_v19 = vmul.f32 1.442695, %v1524_v15 }
 0x7e2   : > { %2532 = vpow2.f32 %v1532_v3  ;;  %v1540_v20 = vmul.f32 1.442695, %v1525_v16 }
 0x7e3   : > { %2534 = vpow2.f32 %v1534_v17 }
 0x7e4   : > { %2536 = vpow2.f32 %v1536_v18 }
 0x7e5   : > { %2538 = vpow2.f32 %v1538_v19 }
 0x7e6   : > { %2540 = vpow2.f32 %v1540_v20 }
 0x7e7   : > { %2542 = vpow2.f32 %v1500_v31 }
 0x7e8   : > { %2544 = vpow2.f32 %v1502_v38 }
 0x7e9   : > { %v2527_v21 = vpop.eup %2526 }
 0x7ea   : > { %v2529_v22 = vpop.eup %2528 }
 0x7eb   : > { %v2531_v23 = vpop.eup %2530  ;;  %v1542_v24 = vadd.f32 %v2529_v22, %v2527_v21 }
 0x7ec   : > { %v2533_v25 = vpop.eup %2532 }
 0x7ed   : > { %v2535_v26 = vpop.eup %2534  ;;  %v1543_v27 = vadd.f32 %v2531_v23, %v1542_v24 }
 0x7ee   : > { %v2537_v28 = vpop.eup %2536 }
 0x7ef   : > { %v1544_v30 = vadd.f32 %v2533_v25, %v1543_v27  ;;  %v1547_v33 = vadd.f32 %v2537_v28, %v2535_v26  ;;  %v2539_v34 = vpop.eup %2538 }
 0x7f0   : > { %v2541_v37 = vpop.eup %2540 }
 0x7f1   : > { %1545 = vadd.xlane.f32.xlu0 %v1544_v30  ;;  %v1548_v35 = vadd.f32 %v2539_v34, %v1547_v33  ;;  %v2543_v39 = vpop.eup %2542 }
 0x7f2   : > { %v1506_v43 = vmul.f32 %v2543_v39, %v1504_v40  ;;  %v2545_v46 = vpop.eup %2544 }
 0x7f3   : > { %v1549_v29 = vadd.f32 %v2541_v37, %v1548_v35  ;;  %v1507_v41 = vmul.f32 %v2545_v46, %v1505_v48 }
 0x7f5   : > { %1550 = vadd.xlane.f32.xlu1 %v1549_v29 }
 0x87e   : > { %v1546_v47 = vpop.xlane.xlu0 %1545 }
 0x87f   : > { %v1552_v49 = vadd.f32 %v1546_v47, %v1506_v43 }
 0x881   : > { %1555 = vst.msk [vmem:[#allocation3] sm:$0xff] %vm1554_vm4, %v1552_v49 }
 0x882   : > { %v1551_v50 = vpop.xlane.xlu1 %1550 }
 0x883   : > { %v1553_v44 = vadd.f32 %v1551_v50, %v1507_v41 }
 0x885   : > { %1556 = vst.msk [vmem:[#allocation3 + $0x8] sm:$0xff] %vm1554_vm4, %v1553_v44 }
 0x886 PF: > { %p2204_p10 = scmp.ne.s32.totalorder %s2745_s19, 1 }
 0x887   : > { %v2548_v51 = vld [vmem:[%s2921_s13 + $0x4] ss:$16 sps:$4 sm:$0xff] (!%p2204_p10)   ;;  %v2550_v53 = vld [vmem:[%s2921_s13 + $0xc] ss:$16 sps:$4 sm:$0xff] (!%p2204_p10)   ;;  %v2765_v55 = vmov (!%p2204_p10), 0   ;;  %v1849_v17 = vlaneseq (!%p2204_p10)  ;;  %vm1936_vm6 = vcmask (!%p2204_p10), 7168  }
 0x888   : > { %1562 = sbr.rel (%p2204_p10) target bundleno = 2903 (0xb57), region = 64  ;;  %1795 = vmatprep.mubr.bf16.mxu0 (!%p2204_p10), %v2765_v55  ;;  %1838 = vmatprep.mubr.bf16.mxu1 (!%p2204_p10), %v2765_v55  ;;  %v2552_v32 = vld [vmem:[%s2921_s13] ss:$16 sps:$4 sm:$0xff] (!%p2204_p10)   ;;  %v2553_v36 = vld [vmem:[%s2921_s13 + $0x8] ss:$16 sps:$4 sm:$0xff] (!%p2204_p10)  }
 0x889   : > { %1763 = vmatprep.subr.bf16.mxu0 (!%p2204_p10), %v2548_v51  ;;  %2546 = vset.pattern.permute.xlu1 (!%p2204_p10), %v2765_v55  ;;  %v2554_v42 = vld [vmem:[%s2921_s13 + $0x24] ss:$16 sps:$4 sm:$0xff] (!%p2204_p10)   ;;  %v2556_v58 = vld [vmem:[%s2921_s13 + $0x2c] ss:$16 sps:$4 sm:$0xff] (!%p2204_p10)   ;;  %v2558_v60 = vld [vmem:[%s2921_s13 + $0x20] ss:$16 sps:$4 sm:$0xff] (!%p2204_p10)  }
 0x88a   : > { %1806 = vmatprep.subr.bf16.mxu1 (!%p2204_p10), %v2550_v53  ;;  %2547 = vset.pattern.permute.xlu0 (!%p2204_p10), %v2765_v55  ;;  %v2559_v45 = vld [vmem:[%s2921_s13 + $0x28] ss:$16 sps:$4 sm:$0xff] (!%p2204_p10)   ;;  %v2560_v61 = vld [vmem:[%s2921_s13 + $0x44] ss:$16 sps:$4 sm:$0xff] (!%p2204_p10)   ;;  %v2562_v62 = vld [vmem:[%s2921_s13 + $0x4c] ss:$16 sps:$4 sm:$0xff] (!%p2204_p10)  }
 0x88b   : > { %1764 = vmatpush1.bf16.msra.mxu0 (!%p2204_p10), %v2552_v32  ;;  %1807 = vmatpush1.bf16.msra.mxu1 (!%p2204_p10), %v2553_v36  ;;  %v2564_v1 = vld [vmem:[%s2921_s13 + $0x40] ss:$16 sps:$4 sm:$0xff] (!%p2204_p10)   ;;  %v2565_v5 = vld [vmem:[%s2921_s13 + $0x48] ss:$16 sps:$4 sm:$0xff] (!%p2204_p10)   ;;  %v2566_v8 = vld [vmem:[%s2921_s13 + $0x64] ss:$16 sps:$4 sm:$0xff] (!%p2204_p10)  }
 0x88c   : > { %1765 = vmatprep.subr.bf16.mxu0 (!%p2204_p10), %v2554_v42  ;;  %1808 = vmatprep.subr.bf16.mxu1 (!%p2204_p10), %v2556_v58  ;;  %v2568_v9 = vld [vmem:[%s2921_s13 + $0x6c] ss:$16 sps:$4 sm:$0xff] (!%p2204_p10)   ;;  %v2570_v10 = vld [vmem:[%s2921_s13 + $0x60] ss:$16 sps:$4 sm:$0xff] (!%p2204_p10)   ;;  %v2571_v52 = vld [vmem:[%s2921_s13 + $0x68] ss:$16 sps:$4 sm:$0xff] (!%p2204_p10)  }
 0x88d   : > { %v2572_v54 = vld [vmem:[%s2921_s13 + $0x84] ss:$16 sps:$4 sm:$0xff] (!%p2204_p10)   ;;  %v2574_v57 = vld [vmem:[%s2921_s13 + $0x8c] ss:$16 sps:$4 sm:$0xff] (!%p2204_p10)   ;;  %v2576_v56 = vld [vmem:[%s2921_s13 + $0x80] ss:$16 sps:$4 sm:$0xff] (!%p2204_p10)  }
 0x88e   : > { %v2577_v59 = vld [vmem:[%s2921_s13 + $0x88] ss:$16 sps:$4 sm:$0xff] (!%p2204_p10)   ;;  %v2578_v63 = vld [vmem:[%s2921_s13 + $0xa4] ss:$16 sps:$4 sm:$0xff] (!%p2204_p10)   ;;  %v2580_v11 = vld [vmem:[%s2921_s13 + $0xac] ss:$16 sps:$4 sm:$0xff] (!%p2204_p10)  }
 0x88f   : > { %1766 = vmatpush1.bf16.msra.mxu0 %v2558_v60  ;;  %1809 = vmatpush1.bf16.msra.mxu1 %v2559_v45  ;;  %v2582_v12 = vld [vmem:[%s2921_s13 + $0xa0] ss:$16 sps:$4 sm:$0xff]   ;;  %v2583_v13 = vld [vmem:[%s2921_s13 + $0xa8] ss:$16 sps:$4 sm:$0xff]   ;;  %v2584_v0 = vld [vmem:[%s2921_s13 + $0xc4] ss:$16 sps:$4 sm:$0xff]  }
 0x890   : > { %1767 = vmatprep.subr.bf16.mxu0 %v2560_v61  ;;  %1810 = vmatprep.subr.bf16.mxu1 %v2562_v62  ;;  %v2586_v2 = vld [vmem:[%s2921_s13 + $0xcc] ss:$16 sps:$4 sm:$0xff]   ;;  %v2588_v4 = vld [vmem:[%s2921_s13 + $0xc0] ss:$16 sps:$4 sm:$0xff]   ;;  %v2589_v3 = vld [vmem:[%s2921_s13 + $0xc8] ss:$16 sps:$4 sm:$0xff]  }
 0x891   : > { %v2590_v6 = vld [vmem:[%s2921_s13 + $0xe4] ss:$16 sps:$4 sm:$0xff]   ;;  %v2592_v7 = vld [vmem:[%s2921_s13 + $0xec] ss:$16 sps:$4 sm:$0xff]   ;;  %v2594_v14 = vld [vmem:[%s2921_s13 + $0xe0] ss:$16 sps:$4 sm:$0xff]  }
 0x892   : > { %v2595_v15 = vld [vmem:[%s2921_s13 + $0xe8] ss:$16 sps:$4 sm:$0xff]   ;;  %v2596_v16 = vld [vmem:[%s3241_s1] sm:$0xff]   ;;  %v1850_v18 = vand.u32 127, %v1849_v17 }
 0x893   : > { %1768 = vmatpush1.bf16.msra.mxu0 %v2564_v1  ;;  %1811 = vmatpush1.bf16.msra.mxu1 %v2565_v5  ;;  %v1866_v38 = vld [vmem:[#allocation2] sm:$0xff]  ;;  %v1867_v43 = vld [vmem:[#allocation2 + $0x8] sm:$0xff] }
 0x894   : > { %1769 = vmatprep.subr.bf16.mxu0 %v2566_v8  ;;  %1812 = vmatprep.subr.bf16.mxu1 %v2568_v9  ;;  %v1852_v19 = vadd.s32 256, %v1850_v18 }
 0x896   : > { %vm1856_vm5 = vcmp.lt.s32.totalorder %v1852_v19, 300  ;;  %v1887_v19 = vld [vmem:[#allocation3 + $0x8] sm:$0xff] }
 0x897   : > { %1770 = vmatpush1.bf16.msra.mxu0 %v2570_v10  ;;  %1813 = vmatpush1.bf16.msra.mxu1 %v2571_v52 }
 0x898   : > { %1771 = vmatprep.subr.bf16.mxu0 %v2572_v54  ;;  %1814 = vmatprep.subr.bf16.mxu1 %v2574_v57 }
 0x89b   : > { %1772 = vmatpush1.bf16.msra.mxu0 %v2576_v56  ;;  %1815 = vmatpush1.bf16.msra.mxu1 %v2577_v59 }
 0x89c   : > { %1773 = vmatprep.subr.bf16.mxu0 %v2578_v63  ;;  %1816 = vmatprep.subr.bf16.mxu1 %v2580_v11 }
 0x89f   : > { %1774 = vmatpush1.bf16.msra.mxu0 %v2582_v12  ;;  %1817 = vmatpush1.bf16.msra.mxu1 %v2583_v13 }
 0x8a0   : > { %1775 = vmatprep.subr.bf16.mxu0 %v2584_v0  ;;  %1818 = vmatprep.subr.bf16.mxu1 %v2586_v2 }
 0x8a3   : > { %1776 = vmatpush1.bf16.msra.mxu0 %v2588_v4  ;;  %1819 = vmatpush1.bf16.msra.mxu1 %v2589_v3 }
 0x8a4   : > { %1777 = vmatprep.subr.bf16.mxu0 %v2590_v6  ;;  %1820 = vmatprep.subr.bf16.mxu1 %v2592_v7 }
 0x8a7   : > { %1778 = vmatpush1.bf16.msra.mxu0 %v2594_v14  ;;  %1821 = vmatpush1.bf16.msra.mxu1 %v2595_v15  ;;  %v1886_v15 = vld [vmem:[#allocation3] sm:$0xff] }
 0x8aa   : > { %1796 = vmatmul.mubr.bf16.vlgmr.msra.gmra.mrb[0].mxu0 %v2596_v16  ;;  %1839 = vmatmul.mubr.bf16.vlgmr.msra.gmra.mrb[0].mxu1 %v2596_v16 }
 0x97d   : > { %v1797_v20 = vpop.f32.mrb[0].mxu0  ;;  %v1840_v21 = vpop.f32.mrb[0].mxu1 }
 0x97e   : > { %v1860_v22 = vsel %vm1856_vm5, %v1840_v21, -1e+30  ;;  %v1799_v23 = vpop.f32.mrb[1].mxu0  ;;  %v1842_v24 = vpop.f32.mrb[1].mxu1 }
 0x97f   : > { %v1868_v25 = vmax.f32 %v1797_v20, %v1860_v22  ;;  %v1869_v26 = vmax.f32 %v1799_v23, -1e+30  ;;  %v1801_v27 = vpop.f32.mrb[2].mxu0  ;;  %v1844_v28 = vpop.f32.mrb[2].mxu1 }
 0x980   : > { %v1864_v30 = vsel %vm1856_vm5, %v1844_v28, -1e+30  ;;  %v1803_v33 = vpop.f32.mrb[3].mxu0  ;;  %v1846_v34 = vpop.f32.mrb[3].mxu1 }
 0x981   : > { %v1873_v35 = vmax.f32 %v1801_v27, %v1864_v30  ;;  %v1874_v37 = vmax.f32 %v1803_v33, -1e+30  ;;  %v1870_v29 = vmax.f32 %v1868_v25, %v1869_v26 }
 0x983   : > { %1871 = vmax.xlane.f32.xlu0 %v1870_v29  ;;  %v1875_v31 = vmax.f32 %v1873_v35, %v1874_v37 }
 0x987   : > { %1876 = vmax.xlane.f32.xlu0 %v1875_v31  ;;  %v1952_v31 = vld [vmem:[#allocation4 + $0x8] sm:$0xff] }
 0xa10   : > { %v1872_v39 = vpop.xlane.xlu0 %1871 }
 0xa11   : > { %v1878_v40 = vmax.f32 %v1866_v38, %v1872_v39 }
 0xa13   : > { %v1880_v46 = vsub.f32 %v1866_v38, %v1878_v40  ;;  %1939 = vst.msk [vmem:[#allocation2] sm:$0xff] %vm1936_vm6, %v1878_v40  ;;  %1892 = vperm.xlu1 %2546, %v1878_v40  }
 0xa14   : > { %v1877_v47 = vpop.xlane.xlu0 %1876 }
 0xa15   : > { %v1879_v48 = vmax.f32 %v1867_v43, %v1877_v47  ;;  %v1882_v6 = vmul.f32 1.442695, %v1880_v46 }
 0xa17   : > { %v1881_v49 = vsub.f32 %v1867_v43, %v1879_v48  ;;  %1940 = vst.msk [vmem:[#allocation2 + $0x8] sm:$0xff] %vm1936_vm6, %v1879_v48  ;;  %1897 = vperm.xlu1 %2546, %v1879_v48  }
 0xa19   : > { %v1884_v7 = vmul.f32 1.442695, %v1881_v49 }
 0xa1a   : > { %v1941_v28 = vld [vmem:[#allocation2] sm:$0xff] }
 0xa1e   : > { %v1942_v29 = vld [vmem:[#allocation2 + $0x8] sm:$0xff] }
 0xa92   : > { %v1893_v41 = vpop.permute.xlu1 %1892 }
 0xa93   : > { %v1900_v50 = vsub.f32 %v1797_v20, %v1893_v41  ;;  %v1901_v44 = vsub.f32 %v1799_v23, %v1893_v41  ;;  %v1902_v51 = vsub.f32 %v1860_v22, %v1893_v41  ;;  %v1903_v53 = vsub.f32 -1e+30, %v1893_v41 }
 0xa95   : > { %v1908_v55 = vmul.f32 1.442695, %v1900_v50  ;;  %v1910_v32 = vmul.f32 1.442695, %v1901_v44  ;;  %v1912_v36 = vmul.f32 1.442695, %v1902_v51 }
 0xa96   : > { %v1914_v42 = vmul.f32 1.442695, %v1903_v53  ;;  %v1898_v58 = vpop.permute.xlu1 %1897 }
 0xa97   : > { %2597 = vpow2.f32 %v1908_v55  ;;  %v1904_v60 = vsub.f32 %v1801_v27, %v1898_v58  ;;  %v1905_v45 = vsub.f32 %v1803_v33, %v1898_v58  ;;  %v1906_v61 = vsub.f32 %v1864_v30, %v1898_v58  ;;  %v1951_v30 = vld [vmem:[#allocation4] sm:$0xff] }
 0xa98   : > { %2599 = vpow2.f32 %v1910_v32  ;;  %v1907_v62 = vsub.f32 -1e+30, %v1898_v58 }
 0xa99   : > { %2601 = vpow2.f32 %v1912_v36  ;;  %v1916_v1 = vmul.f32 1.442695, %v1904_v60  ;;  %v1918_v5 = vmul.f32 1.442695, %v1905_v45  ;;  %v1920_v8 = vmul.f32 1.442695, %v1906_v61 }
 0xa9a   : > { %2603 = vpow2.f32 %v1914_v42  ;;  %v1922_v9 = vmul.f32 1.442695, %v1907_v62 }
 0xa9b   : > { %2605 = vpow2.f32 %v1916_v1 }
 0xa9c   : > { %2607 = vpow2.f32 %v1918_v5 }
 0xa9d   : > { %2609 = vpow2.f32 %v1920_v8 }
 0xa9e   : > { %2611 = vpow2.f32 %v1922_v9 }
 0xa9f   : > { %2613 = vpow2.f32 %v1882_v6 }
 0xaa0   : > { %2615 = vpow2.f32 %v1884_v7 }
 0xaa1   : > { %v2598_v10 = vpop.eup %2597 }
 0xaa2   : > { %v2600_v52 = vpop.eup %2599 }
 0xaa3   : > { %v2602_v54 = vpop.eup %2601  ;;  %v1924_v57 = vadd.f32 %v2600_v52, %v2598_v10 }
 0xaa4   : > { %v2604_v56 = vpop.eup %2603 }
 0xaa5   : > { %v2606_v59 = vpop.eup %2605  ;;  %v1925_v63 = vadd.f32 %v2602_v54, %v1924_v57 }
 0xaa6   : > { %v2608_v11 = vpop.eup %2607 }
 0xaa7   : > { %v1926_v12 = vadd.f32 %v2604_v56, %v1925_v63  ;;  %v1929_v13 = vadd.f32 %v2608_v11, %v2606_v59  ;;  %v2610_v0 = vpop.eup %2609 }
 0xaa8   : > { %v2612_v4 = vpop.eup %2611 }
 0xaa9   : > { %1927 = vadd.xlane.f32.xlu0 %v1926_v12  ;;  %v1930_v2 = vadd.f32 %v2610_v0, %v1929_v13  ;;  %v2614_v14 = vpop.eup %2613 }
 0xaaa   : > { %v1888_v16 = vmul.f32 %v2614_v14, %v1886_v15  ;;  %v2616_v17 = vpop.eup %2615 }
 0xaab   : > { %v1931_v3 = vadd.f32 %v2612_v4, %v1930_v2  ;;  %v1889_v21 = vmul.f32 %v2616_v17, %v1887_v19 }
 0xaad   : > { %1932 = vadd.xlane.f32.xlu1 %v1931_v3 }
 0xb36   : > { %v1928_v18 = vpop.xlane.xlu0 %1927 }
 0xb37   : > { %v1934_v20 = vadd.f32 %v1928_v18, %v1888_v16 }
 0xb39   : > { %1937 = vst.msk [vmem:[#allocation3] sm:$0xff] %vm1936_vm6, %v1934_v20 }
 0xb3a   : > { %v1933_v22 = vpop.xlane.xlu1 %1932 }
 0xb3b   : > { %v1935_v23 = vadd.f32 %v1933_v22, %v1889_v21 }
 0xb3d   : > { %1938 = vst.msk [vmem:[#allocation3 + $0x8] sm:$0xff] %vm1936_vm6, %v1935_v23 }
 0xb40   : > { %v1943_v24 = vld [vmem:[#allocation3] sm:$0xff] }
 0xb41   : > { %2617 = vlog2.f32 %v1943_v24 }
 0xb44   : > { %v1944_v25 = vld [vmem:[#allocation3 + $0x8] sm:$0xff] }
 0xb45   : > { %2619 = vlog2.f32 %v1944_v25 }
 0xb4b   : > { %v2618_v26 = vpop.eup %2617 }
 0xb4c   : > { %v1946_v27 = vmul.f32 0.6931472, %v2618_v26 }
 0xb4e   : > { %v1949_v33 = vadd.f32 %v1946_v27, %v1941_v28 }
 0xb4f   : > { %v2620_v34 = vpop.eup %2619 }
 0xb50   : > { %v1953_v35 = vsub.f32 %v1949_v33, %v1951_v30  ;;  %v1948_v37 = vmul.f32 0.6931472, %v2620_v34 }
 0xb52   : > { %1955 = vst.msk [vmem:[%s3244_s4] sm:$0xff] %vm1936_vm6, %v1953_v35  ;;  %v1950_v38 = vadd.f32 %v1948_v37, %v1942_v29 }
 0xb54   : > { %v1954_v39 = vsub.f32 %v1950_v38, %v1952_v31 }
 0xb56   : > { %1956 = vst.msk [vmem:[%s3244_s4 + $0x8] sm:$0xff] %vm1936_vm6, %v1954_v39 }
 0xb57 PF: > { %s20_s21 = sadd.s32 1, %s2753_s21   ;;  %s3266_s15 = smov %s2733_s16 }
 0xb58   : > { %p17_p12 = scmp.ge.s32.totalorder %s20_s21, 4   ;;  %s3225_s16 = smov 0  }
 0xb59   : > { %s3267_s17 = smov %s2741_s18  ;;  %s3230_s18 = smov 0  }
 0xb5a   : > { %s3268_s19 = smov %s2749_s20  ;;  %s3269_s20 = smov %s3271_s23 }
 0xb5b   :  { %19 = sbr.rel (!%p17_p12) target bundleno = 7 (0x7), region = 115 }
 0xb62   :  { %1979 = vsyncpa [#allocation6], 1 }
 0xb63   :  { %1981 = vsyncpa [#allocation6 + $0x1], 1 }
 0xb64   :  { %1982 = vsyncpa [#allocation8], 1 }
 0xb65   :  { %1984 = vsyncpa [#allocation8 + $0x1], 1 }

</bundles_post_ra>
